<compile_context>
chip_gen: v7x
topology: tpu7x:2x2x1
jax: 0.10.0
libtpu: 0.0.40
codegen_flags: <defaults>
</compile_context>

<pallas_src>
import functools

import jax
import jax.numpy as jnp
from jax.experimental import pallas as pl
from jax.experimental.pallas import tpu as pltpu

# ----------------------------- config (small) -------------------------------
B = 2           # batch
S = 8           # sequence length
V = 128         # vocab size
D = 32          # hidden size
H = 4           # attention heads
KV = 2          # key/value heads (GQA)
HD = D // H     # head dim = 8
I = 64          # MLP intermediate size
L = 2           # number of layers
EPS = 1e-6
ROPE_THETA = 10000.0
NEG_INF = -1e9
DQKV = H * HD + 2 * KV * HD     # fused q|k|v projection width = 64


# ------------------------------ fused Pallas kernel -------------------------
def fused_kernel(ids_ref, amask_ref, cos_ref, sin_ref, emb_ref, lnf_ref,
                 ln1_ref, qkvw_ref, qkvb_ref, ow_ref, ln2_ref, guw_ref, dw_ref,
                 o_ref, x_ref, *, n_heads, n_kv, hd, inter, eps, neg_inf):
    """Grid = (batch, layer).  x_ref is a VMEM scratch carrying the residual
    stream for the current batch row across the (inner, 'arbitrary') layer axis."""
    l = pl.program_id(1)
    n_layers = pl.num_programs(1)
    s = x_ref.shape[0]
    vocab = emb_ref.shape[0]

    # ---- layer step 0: token embedding (one-hot matmul on the MXU) ----------
    @pl.when(l == 0)
    def _():
        ids = ids_ref[0]                                          # (S, 1) int32
        col = jax.lax.broadcasted_iota(jnp.int32, (s, vocab), 1)  # (S, V)
        onehot = (col == ids).astype(jnp.float32)
        # TODO(synk): at the real Qwen2 vocab (~151k) replace this with a
        # scalar-prefetch DMA row gather; at V=128 the one-hot matmul is free.
        x_ref[...] = jnp.dot(onehot, emb_ref[...],
                             preferred_element_type=jnp.float32)

    x = x_ref[...]                                                # (S, D) f32

    def rms(v, w):
        return v * jax.lax.rsqrt(jnp.mean(v * v, axis=-1, keepdims=True) + eps) * w

    # ---- causal + key-padding additive bias built in-kernel -----------------
    amask = amask_ref[0]                                          # (1, S) f32 0/1
    qpos = jax.lax.broadcasted_iota(jnp.int32, (s, s), 0)
    kpos = jax.lax.broadcasted_iota(jnp.int32, (s, s), 1)
    valid = (qpos >= kpos) & (amask > 0.5)                        # (S, S)
    bias = jnp.where(valid, 0.0, neg_inf).astype(jnp.float32)

    cos = cos_ref[...]                                            # (S, hd)
    sin = sin_ref[...]

    # ---- self attention: fused QKV, batched heads, RoPE via slice+concat ----
    xn = rms(x, ln1_ref[0])
    qkv = jnp.dot(xn.astype(jnp.bfloat16), qkvw_ref[0],
                  preferred_element_type=jnp.float32) + qkvb_ref[0]   # (S, DQKV)
    dq = n_heads * hd
    dkv = n_kv * hd
    q2 = qkv[:, :dq]
    k2 = qkv[:, dq:dq + dkv]
    v2 = qkv[:, dq + dkv:]
    grp = n_heads // n_kv

    # head-major (H, S, hd); K/V repeated across the GQA group in-vreg
    qh = jnp.stack([q2[:, h * hd:(h + 1) * hd] for h in range(n_heads)], axis=0)
    kh = jnp.stack([k2[:, (h // grp) * hd:(h // grp + 1) * hd]
                    for h in range(n_heads)], axis=0)
    vh = jnp.stack([v2[:, (h // grp) * hd:(h // grp + 1) * hd]
                    for h in range(n_heads)], axis=0)

    def rope(t):   # rotate_half as lane slice+concat (no matmul, no MXU push)
        rot = jnp.concatenate([-t[..., hd // 2:], t[..., :hd // 2]], axis=-1)
        return t * cos[None] + rot * sin[None]

    qh = rope(qh) * (1.0 / (hd ** 0.5))     # fold 1/sqrt(hd) into q
    kh = rope(kh)

    sc = jnp.einsum('hqd,hkd->hqk',
                    qh.astype(jnp.bfloat16), kh.astype(jnp.bfloat16),
                    preferred_element_type=jnp.float32) + bias[None]   # (H, S, S)
    m = jnp.max(sc, axis=-1, keepdims=True)
    p = jnp.exp(sc - m)
    p = p * pl.reciprocal(jnp.sum(p, axis=-1, keepdims=True), approx=True)
    ctx = jnp.einsum('hqk,hkd->hqd',
                     p.astype(jnp.bfloat16), vh.astype(jnp.bfloat16),
                     preferred_element_type=jnp.float32)               # (H, S, hd)
    ctx2 = jnp.concatenate([ctx[h] for h in range(n_heads)], axis=-1)  # (S, H*hd)
    x1 = x + jnp.dot(ctx2.astype(jnp.bfloat16), ow_ref[0],
                     preferred_element_type=jnp.float32)

    # ---- SwiGLU MLP with fused gate|up matmul --------------------------------
    xn2 = rms(x1, ln2_ref[0])
    gu = jnp.dot(xn2.astype(jnp.bfloat16), guw_ref[0],
                 preferred_element_type=jnp.float32)                   # (S, 2I)
    g = gu[:, :inter]
    u = gu[:, inter:]
    hmlp = (g * jax.nn.sigmoid(g)) * u
    x2 = x1 + jnp.dot(hmlp.astype(jnp.bfloat16), dw_ref[0],
                      preferred_element_type=jnp.float32)

    x_ref[...] = x2                                    # carried in VMEM scratch

    # ---- last layer step: final RMSNorm straight to the output block ---------
    @pl.when(l == n_layers - 1)
    def _():
        o_ref[0] = rms(x2, lnf_ref[...])


# ------------------------------ wrapper --------------------------------------
def build_rope(s, hd, theta):
    inv_freq = 1.0 / (theta ** (jnp.arange(0, hd, 2, dtype=jnp.float32) / hd))
    pos = jnp.arange(s, dtype=jnp.float32)
    freqs = pos[:, None] * inv_freq[None, :]                      # (S, hd/2)
    emb = jnp.concatenate([freqs, freqs], axis=-1)                # (S, hd)
    return jnp.cos(emb), jnp.sin(emb)


def text_encoder_forward(input_ids, attention_mask, params):
    """Pallas implementation of InternVL3TextEncoder.forward -> last_hidden_state."""
    b, s = input_ids.shape
    if attention_mask is None:
        attention_mask = jnp.ones((b, s), jnp.int32)
    ids3 = input_ids.astype(jnp.int32).reshape(b, s, 1)
    amask3 = attention_mask.astype(jnp.float32).reshape(b, 1, s)
    cos, sin = build_rope(s, HD, ROPE_THETA)

    # bf16 weights on the MXU path (halves weight DMA, native MXU dtype);
    # norm weights / biases stay f32.
    qkv_w = params["qkv_w"].astype(jnp.bfloat16)
    o_w = params["o_w"].astype(jnp.bfloat16)
    gu_w = params["gu_w"].astype(jnp.bfloat16)
    down_w = params["down_w"].astype(jnp.bfloat16)

    kernel = functools.partial(fused_kernel, n_heads=H, n_kv=KV, hd=HD,
                               inter=I, eps=EPS, neg_inf=NEG_INF)

    layer_idx = lambda bb, ll: (ll, 0, 0)
    batch_idx = lambda bb, ll: (bb, 0, 0)
    const2 = lambda bb, ll: (0, 0)

    return pl.pallas_call(
        kernel,
        out_shape=jax.ShapeDtypeStruct((b, s, D), jnp.float32),
        grid=(b, L),
        in_specs=[
            pl.BlockSpec((1, s, 1), batch_idx),          # input ids
            pl.BlockSpec((1, 1, s), batch_idx),          # attention mask (1/0)
            pl.BlockSpec((s, HD), const2),               # rope cos
            pl.BlockSpec((s, HD), const2),               # rope sin
            pl.BlockSpec((V, D), const2),                # embedding table
            pl.BlockSpec((1, D), const2),                # final norm weight
            pl.BlockSpec((1, 1, D), layer_idx),          # ln1  (stacked over L)
            pl.BlockSpec((1, D, DQKV), layer_idx),       # fused q|k|v weight
            pl.BlockSpec((1, 1, DQKV), layer_idx),       # fused q|k|v bias
            pl.BlockSpec((1, H * HD, D), layer_idx),     # o_proj weight
            pl.BlockSpec((1, 1, D), layer_idx),          # ln2
            pl.BlockSpec((1, D, 2 * I), layer_idx),      # fused gate|up weight
            pl.BlockSpec((1, I, D), layer_idx),          # down weight
        ],
        out_specs=pl.BlockSpec((1, s, D), batch_idx),
        scratch_shapes=[pltpu.VMEM((s, D), jnp.float32)],
        compiler_params=pltpu.CompilerParams(
            dimension_semantics=("parallel", "arbitrary")),
    )(ids3, amask3, cos, sin, params["embed"], params["ln_f"],
      params["ln1"], qkv_w, params["qkv_b"], o_w, params["ln2"], gu_w, down_w)


# ------------------------------ params ---------------------------------------
def init_params(key):
    scale = 0.02
    ks = jax.random.split(key, 9)
    nrm = lambda k, shp: scale * jax.random.normal(k, shp, jnp.float32)
    lnw = lambda k, shp: 1.0 + 0.05 * jax.random.normal(k, shp, jnp.float32)
    return {
        "embed": nrm(ks[0], (V, D)),
        "ln_f": lnw(ks[1], (1, D)),
        "ln1": lnw(ks[2], (L, 1, D)),
        "qkv_w": nrm(ks[3], (L, D, DQKV)),
        "qkv_b": nrm(ks[4], (L, 1, DQKV)),
        "o_w": nrm(ks[5], (L, H * HD, D)),
        "ln2": lnw(ks[6], (L, 1, D)),
        "gu_w": nrm(ks[7], (L, D, 2 * I)),
        "down_w": nrm(ks[8], (L, I, D)),
    }


# ------------------------------ pure-JAX reference ---------------------------
def reference_forward(input_ids, attention_mask, params, mm_dtype=jnp.float32):
    """Reference forward.  mm_dtype controls the matmul-operand precision so we
    can check both the exact-f32 semantics (loose) and the kernel's
    bf16-matmul / f32-accumulate policy (tight)."""
    b, s = input_ids.shape
    if attention_mask is None:
        attention_mask = jnp.ones((b, s), jnp.int32)
    causal = jnp.tril(jnp.ones((s, s), dtype=bool))
    valid = causal[None] & attention_mask.astype(bool)[:, None, :]
    bias = jnp.where(valid, 0.0, NEG_INF).astype(jnp.float32)[:, None]   # (B,1,S,S)
    cos, sin = build_rope(s, HD, ROPE_THETA)
    grp = H // KV

    def mm(eq, a, w):
        return jnp.einsum(eq, a.astype(mm_dtype), w.astype(mm_dtype),
                          preferred_element_type=jnp.float32)

    def rmsnorm(x, w):
        return x * jax.lax.rsqrt(jnp.mean(x * x, axis=-1, keepdims=True) + EPS) * w

    def rot_half(t):
        return jnp.concatenate([-t[..., HD // 2:], t[..., :HD // 2]], axis=-1)

    x = params["embed"][input_ids]                                  # (B,S,D)
    for li in range(L):
        xn = rmsnorm(x, params["ln1"][li])
        qkv = mm("bsd,de->bse", xn, params["qkv_w"][li]) + params["qkv_b"][li]
        dq, dkv = H * HD, KV * HD
        q = qkv[..., :dq].reshape(b, s, H, HD).transpose(0, 2, 1, 3)
        k = qkv[..., dq:dq + dkv].reshape(b, s, KV, HD).transpose(0, 2, 1, 3)
        v = qkv[..., dq + dkv:].reshape(b, s, KV, HD).transpose(0, 2, 1, 3)
        q = q * cos[None, None] + rot_half(q) * sin[None, None]
        k = k * cos[None, None] + rot_half(k) * sin[None, None]
        k = jnp.repeat(k, grp, axis=1)
        v = jnp.repeat(v, grp, axis=1)
        sc = mm("bhqd,bhkd->bhqk", q, k) / (HD ** 0.5) + bias
        p = jax.nn.softmax(sc, axis=-1)
        ctx = mm("bhqk,bhkd->bhqd", p, v).transpose(0, 2, 1, 3).reshape(b, s, H * HD)
        x = x + mm("bse,ed->bsd", ctx, params["o_w"][li])
        xn2 = rmsnorm(x, params["ln2"][li])
        gu = mm("bsd,di->bsi", xn2, params["gu_w"][li])
        g, u = gu[..., :I], gu[..., I:]
        x = x + mm("bsi,id->bsd", (g * jax.nn.sigmoid(g)) * u, params["down_w"][li])
    return rmsnorm(x, params["ln_f"])


# ------------------------------------ main -----------------------------------
if __name__ == "__main__":
    key = jax.random.PRNGKey(0)
    k_param, k_ids = jax.random.split(key)
    params = init_params(k_param)

    input_ids = jax.random.randint(k_ids, (B, S), 0, V, dtype=jnp.int32)
    attention_mask = jnp.array([[1] * S, [1] * (S - 2) + [0] * 2], dtype=jnp.int32)

    fwd = jax.jit(text_encoder_forward)
    out = jax.block_until_ready(fwd(input_ids, attention_mask, params))

    assert out.shape == (B, S, D) and out.dtype == jnp.float32
    assert bool(jnp.all(jnp.isfinite(out)))

    ref_matched = reference_forward(input_ids, attention_mask, params,
                                    mm_dtype=jnp.bfloat16)   # same precision policy
    ref_f32 = reference_forward(input_ids, attention_mask, params,
                                mm_dtype=jnp.float32)         # exact-f32 sanity
    d_tight = float(jnp.max(jnp.abs(out - ref_matched)))
    d_loose = float(jnp.max(jnp.abs(out - ref_f32)))
    assert d_tight < 2e-2, f"mismatch vs bf16-matmul reference: {d_tight}"
    assert d_loose < 1e-1, f"mismatch vs f32 reference: {d_loose}"
    print("KERNEL_OK")
</pallas_src>

<mosaic_0001>
module attributes {stable_mosaic.version = 11 : i64} {
  func.func @fused_kernel(%arg0: i32, %arg1: i32, %arg2: memref<1x8x1xi32, #tpu.memory_space<vmem>>, %arg3: memref<1x1x8xf32, #tpu.memory_space<vmem>>, %arg4: memref<8x8xf32, #tpu.memory_space<vmem>>, %arg5: memref<8x8xf32, #tpu.memory_space<vmem>>, %arg6: memref<128x32xf32, #tpu.memory_space<vmem>>, %arg7: memref<1x32xf32, #tpu.memory_space<vmem>>, %arg8: memref<1x1x32xf32, #tpu.memory_space<vmem>>, %arg9: memref<1x32x64xbf16, #tpu.memory_space<vmem>>, %arg10: memref<1x1x64xf32, #tpu.memory_space<vmem>>, %arg11: memref<1x32x32xbf16, #tpu.memory_space<vmem>>, %arg12: memref<1x1x32xf32, #tpu.memory_space<vmem>>, %arg13: memref<1x32x128xbf16, #tpu.memory_space<vmem>>, %arg14: memref<1x64x32xbf16, #tpu.memory_space<vmem>>, %arg15: memref<1x8x32xf32, #tpu.memory_space<vmem>>, %arg16: memref<8x32xf32, #tpu.memory_space<vmem>>) attributes {dimension_semantics = [#tpu.dimension_semantics<parallel>, #tpu.dimension_semantics<arbitrary>], iteration_bounds = array<i64: 2, 2>, scalar_prefetch = 0 : i64, scratch_operands = 1 : i64, tpu.core_type = #tpu.core_type<tc>, window_params = [{transform_indices = @transform_0, window_bounds = array<i64: 1, 8, 1>}, {transform_indices = @transform_1, window_bounds = array<i64: 1, 1, 8>}, {pipeline_mode = #tpu.pipeline_mode<synchronous>, transform_indices = @transform_2, window_bounds = array<i64: 8, 8>}, {pipeline_mode = #tpu.pipeline_mode<synchronous>, transform_indices = @transform_3, window_bounds = array<i64: 8, 8>}, {pipeline_mode = #tpu.pipeline_mode<synchronous>, transform_indices = @transform_4, window_bounds = array<i64: 128, 32>}, {pipeline_mode = #tpu.pipeline_mode<synchronous>, transform_indices = @transform_5, window_bounds = array<i64: 1, 32>}, {transform_indices = @transform_6, window_bounds = array<i64: 1, 1, 32>}, {transform_indices = @transform_7, window_bounds = array<i64: 1, 32, 64>}, {transform_indices = @transform_8, window_bounds = array<i64: 1, 1, 64>}, {transform_indices = @transform_9, window_bounds = array<i64: 1, 32, 32>}, {transform_indices = @transform_10, window_bounds = array<i64: 1, 1, 32>}, {transform_indices = @transform_11, window_bounds = array<i64: 1, 32, 128>}, {transform_indices = @transform_12, window_bounds = array<i64: 1, 64, 32>}, {transform_indices = @transform_13, window_bounds = array<i64: 1, 8, 32>}]} {
    %c0_i32 = arith.constant 0 : i32
    %0 = arith.cmpi eq, %arg1, %c0_i32 : i32
    %1 = arith.extui %0 : i1 to i32
    %c0_i32_0 = arith.constant 0 : i32
    %2 = arith.cmpi ne, %1, %c0_i32_0 : i32
    scf.if %2 {
      %c0_53 = arith.constant 0 : index
      %c0_54 = arith.constant 0 : index
      %c0_55 = arith.constant 0 : index
      %165 = vector.load %arg2[%c0_53, %c0_54, %c0_55] : memref<1x8x1xi32, #tpu.memory_space<vmem>>, vector<1x8x1xi32>
      %166 = vector.shape_cast %165 : vector<1x8x1xi32> to vector<8x1xi32>
      %167 = tpu.iota {dimensions = array<i32: 1>} : vector<8x128xi32>
      %168 = vector.broadcast %166 : vector<8x1xi32> to vector<8x128xi32>
      %169 = arith.cmpi eq, %167, %168 : vector<8x128xi32>
      %170 = arith.extui %169 : vector<8x128xi1> to vector<8x128xi32>
      %171 = arith.sitofp %170 : vector<8x128xi32> to vector<8x128xf32>
      %c0_56 = arith.constant 0 : index
      %c0_57 = arith.constant 0 : index
      %172 = vector.load %arg6[%c0_56, %c0_57] : memref<128x32xf32, #tpu.memory_space<vmem>>, vector<128x32xf32>
      %cst_58 = arith.constant dense<0.000000e+00> : vector<8x32xf32>
      %173 = tpu.matmul %171, %172, %cst_58 {dimension_numbers = #tpu.dot_dimension_numbers<[1], [0], [0], [1], [0, 0, 1, 1], [], []>} : vector<8x128xf32>, vector<128x32xf32>, vector<8x32xf32> -> vector<8x32xf32>
      %c0_59 = arith.constant 0 : index
      %c0_60 = arith.constant 0 : index
      %174 = vector.load %arg16[%c0_59, %c0_60] : memref<8x32xf32, #tpu.memory_space<vmem>>, vector<8x32xf32>
      tpu.vector_store %arg16[%c0_59, %c0_60], %173 {strides = array<i32>} : memref<8x32xf32, #tpu.memory_space<vmem>>, vector<8x32xf32>,
    } else {
    }
    %c0 = arith.constant 0 : index
    %c0_1 = arith.constant 0 : index
    %3 = vector.load %arg16[%c0, %c0_1] : memref<8x32xf32, #tpu.memory_space<vmem>>, vector<8x32xf32>
    %c0_2 = arith.constant 0 : index
    %c0_3 = arith.constant 0 : index
    %c0_4 = arith.constant 0 : index
    %4 = vector.load %arg3[%c0_2, %c0_3, %c0_4] : memref<1x1x8xf32, #tpu.memory_space<vmem>>, vector<1x1x8xf32>
    %5 = vector.shape_cast %4 : vector<1x1x8xf32> to vector<1x8xf32>
    %6 = tpu.iota {dimensions = array<i32: 0>} : vector<8x8xi32>
    %7 = tpu.iota {dimensions = array<i32: 1>} : vector<8x8xi32>
    %8 = arith.cmpi sge, %6, %7 : vector<8x8xi32>
    %cst = arith.constant 5.000000e-01 : f32
    %9 = vector.broadcast %cst : f32 to vector<1x8xf32>
    %10 = arith.cmpf ogt, %5, %9 : vector<1x8xf32>
    %11 = vector.broadcast %10 : vector<1x8xi1> to vector<8x8xi1>
    %12 = arith.andi %8, %11 : vector<8x8xi1>
    %cst_5 = arith.constant 0.000000e+00 : f32
    %cst_6 = arith.constant -1.000000e+09 : f32
    %13 = vector.broadcast %cst_5 : f32 to vector<8x8xf32>
    %14 = vector.broadcast %cst_6 : f32 to vector<8x8xf32>
    %15 = arith.select %12, %13, %14 : vector<8x8xi1>, vector<8x8xf32>
    %c0_7 = arith.constant 0 : index
    %c0_8 = arith.constant 0 : index
    %16 = vector.load %arg4[%c0_7, %c0_8] : memref<8x8xf32, #tpu.memory_space<vmem>>, vector<8x8xf32>
    %c0_9 = arith.constant 0 : index
    %c0_10 = arith.constant 0 : index
    %17 = vector.load %arg5[%c0_9, %c0_10] : memref<8x8xf32, #tpu.memory_space<vmem>>, vector<8x8xf32>
    %c0_11 = arith.constant 0 : index
    %c0_12 = arith.constant 0 : index
    %c0_13 = arith.constant 0 : index
    %18 = vector.load %arg8[%c0_11, %c0_12, %c0_13] : memref<1x1x32xf32, #tpu.memory_space<vmem>>, vector<1x1x32xf32>
    %19 = vector.shape_cast %18 : vector<1x1x32xf32> to vector<1x32xf32>
    %20 = arith.mulf %3, %3 : vector<8x32xf32>
    %cst_14 = arith.constant dense<0.000000e+00> : vector<8xf32>
    %21 = vector.multi_reduction <add>, %20, %cst_14 [1] : vector<8x32xf32> to vector<8xf32>
    %22 = vector.shape_cast %21 : vector<8xf32> to vector<8x1xf32>
    %cst_15 = arith.constant 3.200000e+01 : f32
    %23 = vector.broadcast %cst_15 : f32 to vector<8x1xf32>
    %24 = arith.divf %22, %23 : vector<8x1xf32>
    %cst_16 = arith.constant 9.99999997E-7 : f32
    %25 = vector.broadcast %cst_16 : f32 to vector<8x1xf32>
    %26 = arith.addf %24, %25 : vector<8x1xf32>
    %27 = math.rsqrt %26 : vector<8x1xf32>
    %28 = vector.broadcast %27 : vector<8x1xf32> to vector<8x32xf32>
    %29 = arith.mulf %3, %28 : vector<8x32xf32>
    %30 = vector.broadcast %19 : vector<1x32xf32> to vector<8x32xf32>
    %31 = arith.mulf %29, %30 : vector<8x32xf32>
    %32 = arith.truncf %31 : vector<8x32xf32> to vector<8x32xbf16>
    %c0_17 = arith.constant 0 : index
    %c0_18 = arith.constant 0 : index
    %c0_19 = arith.constant 0 : index
    %33 = vector.load %arg9[%c0_17, %c0_18, %c0_19] : memref<1x32x64xbf16, #tpu.memory_space<vmem>>, vector<1x32x64xbf16>
    %34 = vector.shape_cast %33 : vector<1x32x64xbf16> to vector<32x64xbf16>
    %cst_20 = arith.constant dense<0.000000e+00> : vector<8x64xf32>
    %35 = tpu.matmul %32, %34, %cst_20 {dimension_numbers = #tpu.dot_dimension_numbers<[1], [0], [0], [1], [0, 0, 1, 1], [], []>} : vector<8x32xbf16>, vector<32x64xbf16>, vector<8x64xf32> -> vector<8x64xf32>
    %c0_21 = arith.constant 0 : index
    %c0_22 = arith.constant 0 : index
    %c0_23 = arith.constant 0 : index
    %36 = vector.load %arg10[%c0_21, %c0_22, %c0_23] : memref<1x1x64xf32, #tpu.memory_space<vmem>>, vector<1x1x64xf32>
    %37 = vector.shape_cast %36 : vector<1x1x64xf32> to vector<1x64xf32>
    %38 = vector.broadcast %37 : vector<1x64xf32> to vector<8x64xf32>
    %39 = arith.addf %35, %38 : vector<8x64xf32>
    %40 = vector.extract_strided_slice %39 {offsets = [0, 0], sizes = [8, 32], strides = [1, 1]} : vector<8x64xf32> to vector<8x32xf32>
    %41 = vector.extract_strided_slice %39 {offsets = [0, 32], sizes = [8, 16], strides = [1, 1]} : vector<8x64xf32> to vector<8x16xf32>
    %42 = vector.extract_strided_slice %39 {offsets = [0, 48], sizes = [8, 16], strides = [1, 1]} : vector<8x64xf32> to vector<8x16xf32>
    %43 = vector.extract_strided_slice %40 {offsets = [0, 0], sizes = [8, 8], strides = [1, 1]} : vector<8x32xf32> to vector<8x8xf32>
    %44 = vector.extract_strided_slice %40 {offsets = [0, 8], sizes = [8, 8], strides = [1, 1]} : vector<8x32xf32> to vector<8x8xf32>
    %45 = vector.extract_strided_slice %40 {offsets = [0, 16], sizes = [8, 8], strides = [1, 1]} : vector<8x32xf32> to vector<8x8xf32>
    %46 = vector.extract_strided_slice %40 {offsets = [0, 24], sizes = [8, 8], strides = [1, 1]} : vector<8x32xf32> to vector<8x8xf32>
    %47 = vector.shape_cast %43 : vector<8x8xf32> to vector<1x8x8xf32>
    %48 = vector.shape_cast %44 : vector<8x8xf32> to vector<1x8x8xf32>
    %49 = vector.shape_cast %45 : vector<8x8xf32> to vector<1x8x8xf32>
    %50 = vector.shape_cast %46 : vector<8x8xf32> to vector<1x8x8xf32>
    %51 = tpu.concatenate %47, %48, %49, %50 in 0 : vector<1x8x8xf32>, vector<1x8x8xf32>, vector<1x8x8xf32>, vector<1x8x8xf32> -> vector<4x8x8xf32>
    %52 = vector.extract_strided_slice %41 {offsets = [0, 0], sizes = [8, 8], strides = [1, 1]} : vector<8x16xf32> to vector<8x8xf32>
    %53 = vector.extract_strided_slice %41 {offsets = [0, 0], sizes = [8, 8], strides = [1, 1]} : vector<8x16xf32> to vector<8x8xf32>
    %54 = vector.extract_strided_slice %41 {offsets = [0, 8], sizes = [8, 8], strides = [1, 1]} : vector<8x16xf32> to vector<8x8xf32>
    %55 = vector.extract_strided_slice %41 {offsets = [0, 8], sizes = [8, 8], strides = [1, 1]} : vector<8x16xf32> to vector<8x8xf32>
    %56 = vector.shape_cast %52 : vector<8x8xf32> to vector<1x8x8xf32>
    %57 = vector.shape_cast %53 : vector<8x8xf32> to vector<1x8x8xf32>
    %58 = vector.shape_cast %54 : vector<8x8xf32> to vector<1x8x8xf32>
    %59 = vector.shape_cast %55 : vector<8x8xf32> to vector<1x8x8xf32>
    %60 = tpu.concatenate %56, %57, %58, %59 in 0 : vector<1x8x8xf32>, vector<1x8x8xf32>, vector<1x8x8xf32>, vector<1x8x8xf32> -> vector<4x8x8xf32>
    %61 = vector.extract_strided_slice %42 {offsets = [0, 0], sizes = [8, 8], strides = [1, 1]} : vector<8x16xf32> to vector<8x8xf32>
    %62 = vector.extract_strided_slice %42 {offsets = [0, 0], sizes = [8, 8], strides = [1, 1]} : vector<8x16xf32> to vector<8x8xf32>
    %63 = vector.extract_strided_slice %42 {offsets = [0, 8], sizes = [8, 8], strides = [1, 1]} : vector<8x16xf32> to vector<8x8xf32>
    %64 = vector.extract_strided_slice %42 {offsets = [0, 8], sizes = [8, 8], strides = [1, 1]} : vector<8x16xf32> to vector<8x8xf32>
    %65 = vector.shape_cast %61 : vector<8x8xf32> to vector<1x8x8xf32>
    %66 = vector.shape_cast %62 : vector<8x8xf32> to vector<1x8x8xf32>
    %67 = vector.shape_cast %63 : vector<8x8xf32> to vector<1x8x8xf32>
    %68 = vector.shape_cast %64 : vector<8x8xf32> to vector<1x8x8xf32>
    %69 = tpu.concatenate %65, %66, %67, %68 in 0 : vector<1x8x8xf32>, vector<1x8x8xf32>, vector<1x8x8xf32>, vector<1x8x8xf32> -> vector<4x8x8xf32>
    %70 = vector.extract_strided_slice %51 {offsets = [0, 0, 4], sizes = [4, 8, 4], strides = [1, 1, 1]} : vector<4x8x8xf32> to vector<4x8x4xf32>
    %cst_24 = arith.constant 0.000000e+00 : f32
    %71 = vector.broadcast %cst_24 : f32 to vector<4x8x4xf32>
    %72 = arith.subf %71, %70 : vector<4x8x4xf32>
    %73 = vector.extract_strided_slice %51 {offsets = [0, 0, 0], sizes = [4, 8, 4], strides = [1, 1, 1]} : vector<4x8x8xf32> to vector<4x8x4xf32>
    %74 = tpu.concatenate %72, %73 in 2 : vector<4x8x4xf32>, vector<4x8x4xf32> -> vector<4x8x8xf32>
    %75 = vector.shape_cast %16 : vector<8x8xf32> to vector<1x8x8xf32>
    %76 = vector.broadcast %75 : vector<1x8x8xf32> to vector<4x8x8xf32>
    %77 = arith.mulf %51, %76 : vector<4x8x8xf32>
    %78 = vector.shape_cast %17 : vector<8x8xf32> to vector<1x8x8xf32>
    %79 = vector.broadcast %78 : vector<1x8x8xf32> to vector<4x8x8xf32>
    %80 = arith.mulf %74, %79 : vector<4x8x8xf32>
    %81 = arith.addf %77, %80 : vector<4x8x8xf32>
    %cst_25 = arith.constant 0.353553385 : f32
    %82 = vector.broadcast %cst_25 : f32 to vector<4x8x8xf32>
    %83 = arith.mulf %81, %82 : vector<4x8x8xf32>
    %84 = vector.extract_strided_slice %60 {offsets = [0, 0, 4], sizes = [4, 8, 4], strides = [1, 1, 1]} : vector<4x8x8xf32> to vector<4x8x4xf32>
    %cst_26 = arith.constant 0.000000e+00 : f32
    %85 = vector.broadcast %cst_26 : f32 to vector<4x8x4xf32>
    %86 = arith.subf %85, %84 : vector<4x8x4xf32>
    %87 = vector.extract_strided_slice %60 {offsets = [0, 0, 0], sizes = [4, 8, 4], strides = [1, 1, 1]} : vector<4x8x8xf32> to vector<4x8x4xf32>
    %88 = tpu.concatenate %86, %87 in 2 : vector<4x8x4xf32>, vector<4x8x4xf32> -> vector<4x8x8xf32>
    %89 = vector.shape_cast %16 : vector<8x8xf32> to vector<1x8x8xf32>
    %90 = vector.broadcast %89 : vector<1x8x8xf32> to vector<4x8x8xf32>
    %91 = arith.mulf %60, %90 : vector<4x8x8xf32>
    %92 = vector.shape_cast %17 : vector<8x8xf32> to vector<1x8x8xf32>
    %93 = vector.broadcast %92 : vector<1x8x8xf32> to vector<4x8x8xf32>
    %94 = arith.mulf %88, %93 : vector<4x8x8xf32>
    %95 = arith.addf %91, %94 : vector<4x8x8xf32>
    %96 = arith.truncf %83 : vector<4x8x8xf32> to vector<4x8x8xbf16>
    %97 = arith.truncf %95 : vector<4x8x8xf32> to vector<4x8x8xbf16>
    "tpu.trace_start"() <{level = 10 : i32, message = "hqd,hkd->hqk"}> : () -> ()
    %cst_27 = arith.constant dense<0.000000e+00> : vector<4x8x8xf32>
    %98 = tpu.matmul %96, %97, %cst_27 {dimension_numbers = #tpu.dot_dimension_numbers<[2], [2], [1], [1], [0, 0, 0, 1, 1, 1], [0], [0]>} : vector<4x8x8xbf16>, vector<4x8x8xbf16>, vector<4x8x8xf32> -> vector<4x8x8xf32>
    "tpu.trace_stop"() : () -> ()
    %99 = vector.shape_cast %15 : vector<8x8xf32> to vector<1x8x8xf32>
    %100 = vector.broadcast %99 : vector<1x8x8xf32> to vector<4x8x8xf32>
    %101 = arith.addf %98, %100 : vector<4x8x8xf32>
    %cst_28 = arith.constant dense<0xFF800000> : vector<4x8xf32>
    %102 = vector.multi_reduction <maximumf>, %101, %cst_28 [2] : vector<4x8x8xf32> to vector<4x8xf32>
    %103 = vector.shape_cast %102 : vector<4x8xf32> to vector<4x8x1xf32>
    %104 = vector.broadcast %103 : vector<4x8x1xf32> to vector<4x8x8xf32>
    %105 = arith.subf %101, %104 : vector<4x8x8xf32>
    %106 = math.exp %105 : vector<4x8x8xf32>
    %cst_29 = arith.constant dense<0.000000e+00> : vector<4x8xf32>
    %107 = vector.multi_reduction <add>, %106, %cst_29 [2] : vector<4x8x8xf32> to vector<4x8xf32>
    %108 = vector.shape_cast %107 : vector<4x8xf32> to vector<4x8x1xf32>
    %109 = tpu.reciprocal %108 {approx = true} : vector<4x8x1xf32> -> vector<4x8x1xf32>
    %110 = vector.broadcast %109 : vector<4x8x1xf32> to vector<4x8x8xf32>
    %111 = arith.mulf %106, %110 : vector<4x8x8xf32>
    %112 = arith.truncf %111 : vector<4x8x8xf32> to vector<4x8x8xbf16>
    %113 = arith.truncf %69 : vector<4x8x8xf32> to vector<4x8x8xbf16>
    "tpu.trace_start"() <{level = 10 : i32, message = "hqk,hkd->hqd"}> : () -> ()
    %cst_30 = arith.constant dense<0.000000e+00> : vector<4x8x8xf32>
    %114 = tpu.matmul %112, %113, %cst_30 {dimension_numbers = #tpu.dot_dimension_numbers<[2], [1], [1], [2], [0, 0, 0, 1, 1, 2], [0], [0]>} : vector<4x8x8xbf16>, vector<4x8x8xbf16>, vector<4x8x8xf32> -> vector<4x8x8xf32>
    "tpu.trace_stop"() : () -> ()
    %115 = vector.extract_strided_slice %114 {offsets = [0, 0, 0], sizes = [1, 8, 8], strides = [1, 1, 1]} : vector<4x8x8xf32> to vector<1x8x8xf32>
    %116 = vector.shape_cast %115 : vector<1x8x8xf32> to vector<8x8xf32>
    %117 = vector.extract_strided_slice %114 {offsets = [1, 0, 0], sizes = [1, 8, 8], strides = [1, 1, 1]} : vector<4x8x8xf32> to vector<1x8x8xf32>
    %118 = vector.shape_cast %117 : vector<1x8x8xf32> to vector<8x8xf32>
    %119 = vector.extract_strided_slice %114 {offsets = [2, 0, 0], sizes = [1, 8, 8], strides = [1, 1, 1]} : vector<4x8x8xf32> to vector<1x8x8xf32>
    %120 = vector.shape_cast %119 : vector<1x8x8xf32> to vector<8x8xf32>
    %121 = vector.extract_strided_slice %114 {offsets = [3, 0, 0], sizes = [1, 8, 8], strides = [1, 1, 1]} : vector<4x8x8xf32> to vector<1x8x8xf32>
    %122 = vector.shape_cast %121 : vector<1x8x8xf32> to vector<8x8xf32>
    %123 = tpu.concatenate %116, %118, %120, %122 in 1 : vector<8x8xf32>, vector<8x8xf32>, vector<8x8xf32>, vector<8x8xf32> -> vector<8x32xf32>
    %124 = arith.truncf %123 : vector<8x32xf32> to vector<8x32xbf16>
    %c0_31 = arith.constant 0 : index
    %c0_32 = arith.constant 0 : index
    %c0_33 = arith.constant 0 : index
    %125 = vector.load %arg11[%c0_31, %c0_32, %c0_33] : memref<1x32x32xbf16, #tpu.memory_space<vmem>>, vector<1x32x32xbf16>
    %126 = vector.shape_cast %125 : vector<1x32x32xbf16> to vector<32x32xbf16>
    %cst_34 = arith.constant dense<0.000000e+00> : vector<8x32xf32>
    %127 = tpu.matmul %124, %126, %cst_34 {dimension_numbers = #tpu.dot_dimension_numbers<[1], [0], [0], [1], [0, 0, 1, 1], [], []>} : vector<8x32xbf16>, vector<32x32xbf16>, vector<8x32xf32> -> vector<8x32xf32>
    %128 = arith.addf %3, %127 : vector<8x32xf32>
    %c0_35 = arith.constant 0 : index
    %c0_36 = arith.constant 0 : index
    %c0_37 = arith.constant 0 : index
    %129 = vector.load %arg12[%c0_35, %c0_36, %c0_37] : memref<1x1x32xf32, #tpu.memory_space<vmem>>, vector<1x1x32xf32>
    %130 = vector.shape_cast %129 : vector<1x1x32xf32> to vector<1x32xf32>
    %131 = arith.mulf %128, %128 : vector<8x32xf32>
    %cst_38 = arith.constant dense<0.000000e+00> : vector<8xf32>
    %132 = vector.multi_reduction <add>, %131, %cst_38 [1] : vector<8x32xf32> to vector<8xf32>
    %133 = vector.shape_cast %132 : vector<8xf32> to vector<8x1xf32>
    %cst_39 = arith.constant 3.200000e+01 : f32
    %134 = vector.broadcast %cst_39 : f32 to vector<8x1xf32>
    %135 = arith.divf %133, %134 : vector<8x1xf32>
    %cst_40 = arith.constant 9.99999997E-7 : f32
    %136 = vector.broadcast %cst_40 : f32 to vector<8x1xf32>
    %137 = arith.addf %135, %136 : vector<8x1xf32>
    %138 = math.rsqrt %137 : vector<8x1xf32>
    %139 = vector.broadcast %138 : vector<8x1xf32> to vector<8x32xf32>
    %140 = arith.mulf %128, %139 : vector<8x32xf32>
    %141 = vector.broadcast %130 : vector<1x32xf32> to vector<8x32xf32>
    %142 = arith.mulf %140, %141 : vector<8x32xf32>
    %143 = arith.truncf %142 : vector<8x32xf32> to vector<8x32xbf16>
    %c0_41 = arith.constant 0 : index
    %c0_42 = arith.constant 0 : index
    %c0_43 = arith.constant 0 : index
    %144 = vector.load %arg13[%c0_41, %c0_42, %c0_43] : memref<1x32x128xbf16, #tpu.memory_space<vmem>>, vector<1x32x128xbf16>
    %145 = vector.shape_cast %144 : vector<1x32x128xbf16> to vector<32x128xbf16>
    %cst_44 = arith.constant dense<0.000000e+00> : vector<8x128xf32>
    %146 = tpu.matmul %143, %145, %cst_44 {dimension_numbers = #tpu.dot_dimension_numbers<[1], [0], [0], [1], [0, 0, 1, 1], [], []>} : vector<8x32xbf16>, vector<32x128xbf16>, vector<8x128xf32> -> vector<8x128xf32>
    %147 = vector.extract_strided_slice %146 {offsets = [0, 0], sizes = [8, 64], strides = [1, 1]} : vector<8x128xf32> to vector<8x64xf32>
    %148 = vector.extract_strided_slice %146 {offsets = [0, 64], sizes = [8, 64], strides = [1, 1]} : vector<8x128xf32> to vector<8x64xf32>
    %149 = arith.negf %147 : vector<8x64xf32>
    %150 = math.exp %149 : vector<8x64xf32>
    %cst_45 = arith.constant 1.000000e+00 : f32
    %151 = vector.broadcast %cst_45 : f32 to vector<8x64xf32>
    %152 = arith.addf %151, %150 : vector<8x64xf32>
    %153 = arith.divf %151, %152 : vector<8x64xf32>
    %154 = arith.mulf %147, %153 : vector<8x64xf32>
    %155 = arith.mulf %154, %148 : vector<8x64xf32>
    %156 = arith.truncf %155 : vector<8x64xf32> to vector<8x64xbf16>
    %c0_46 = arith.constant 0 : index
    %c0_47 = arith.constant 0 : index
    %c0_48 = arith.constant 0 : index
    %157 = vector.load %arg14[%c0_46, %c0_47, %c0_48] : memref<1x64x32xbf16, #tpu.memory_space<vmem>>, vector<1x64x32xbf16>
    %158 = vector.shape_cast %157 : vector<1x64x32xbf16> to vector<64x32xbf16>
    %cst_49 = arith.constant dense<0.000000e+00> : vector<8x32xf32>
    %159 = tpu.matmul %156, %158, %cst_49 {dimension_numbers = #tpu.dot_dimension_numbers<[1], [0], [0], [1], [0, 0, 1, 1], [], []>} : vector<8x64xbf16>, vector<64x32xbf16>, vector<8x32xf32> -> vector<8x32xf32>
    %160 = arith.addf %128, %159 : vector<8x32xf32>
    %c0_50 = arith.constant 0 : index
    %c0_51 = arith.constant 0 : index
    %161 = vector.load %arg16[%c0_50, %c0_51] : memref<8x32xf32, #tpu.memory_space<vmem>>, vector<8x32xf32>
    tpu.vector_store %arg16[%c0_50, %c0_51], %160 {strides = array<i32>} : memref<8x32xf32, #tpu.memory_space<vmem>>, vector<8x32xf32>,
    %c1_i32 = arith.constant 1 : i32
    %162 = arith.cmpi eq, %arg1, %c1_i32 : i32
    %163 = arith.extui %162 : i1 to i32
    %c0_i32_52 = arith.constant 0 : i32
    %164 = arith.cmpi ne, %163, %c0_i32_52 : i32
    scf.if %164 {
      %c0_53 = arith.constant 0 : index
      %c0_54 = arith.constant 0 : index
      %165 = vector.load %arg7[%c0_53, %c0_54] : memref<1x32xf32, #tpu.memory_space<vmem>>, vector<1x32xf32>
      %166 = arith.mulf %160, %160 : vector<8x32xf32>
      %cst_55 = arith.constant dense<0.000000e+00> : vector<8xf32>
      %167 = vector.multi_reduction <add>, %166, %cst_55 [1] : vector<8x32xf32> to vector<8xf32>
      %168 = vector.shape_cast %167 : vector<8xf32> to vector<8x1xf32>
      %cst_56 = arith.constant 3.200000e+01 : f32
      %169 = vector.broadcast %cst_56 : f32 to vector<8x1xf32>
      %170 = arith.divf %168, %169 : vector<8x1xf32>
      %cst_57 = arith.constant 9.99999997E-7 : f32
      %171 = vector.broadcast %cst_57 : f32 to vector<8x1xf32>
      %172 = arith.addf %170, %171 : vector<8x1xf32>
      %173 = math.rsqrt %172 : vector<8x1xf32>
      %174 = vector.broadcast %173 : vector<8x1xf32> to vector<8x32xf32>
      %175 = arith.mulf %160, %174 : vector<8x32xf32>
      %176 = vector.broadcast %165 : vector<1x32xf32> to vector<8x32xf32>
      %177 = arith.mulf %175, %176 : vector<8x32xf32>
      %c0_58 = arith.constant 0 : index
      %c0_59 = arith.constant 0 : index
      %c0_60 = arith.constant 0 : index
      %178 = vector.load %arg15[%c0_58, %c0_59, %c0_60] : memref<1x8x32xf32, #tpu.memory_space<vmem>>, vector<1x8x32xf32>
      %179 = vector.shape_cast %178 : vector<1x8x32xf32> to vector<8x32xf32>
      %180 = vector.shape_cast %177 : vector<8x32xf32> to vector<1x8x32xf32>
      tpu.vector_store %arg15[%c0_58, %c0_59, %c0_60], %180 {strides = array<i32>} : memref<1x8x32xf32, #tpu.memory_space<vmem>>, vector<1x8x32xf32>,
    } else {
    }
    return
  }
  func.func @transform_0(%arg0: i32, %arg1: i32) -> (i32, i32, i32) {
    %c0_i32 = arith.constant 0 : i32
    %c0_i32_0 = arith.constant 0 : i32
    %c0_i32_1 = arith.constant 0 : i32
    return %arg0, %c0_i32, %c0_i32_0 : i32, i32, i32
  }
  func.func @transform_1(%arg0: i32, %arg1: i32) -> (i32, i32, i32) {
    %c0_i32 = arith.constant 0 : i32
    %c0_i32_0 = arith.constant 0 : i32
    %c0_i32_1 = arith.constant 0 : i32
    return %arg0, %c0_i32, %c0_i32_0 : i32, i32, i32
  }
  func.func @transform_2(%arg0: i32, %arg1: i32) -> (i32, i32) {
    %c0_i32 = arith.constant 0 : i32
    %c0_i32_0 = arith.constant 0 : i32
    %c0_i32_1 = arith.constant 0 : i32
    return %c0_i32, %c0_i32_0 : i32, i32
  }
  func.func @transform_3(%arg0: i32, %arg1: i32) -> (i32, i32) {
    %c0_i32 = arith.constant 0 : i32
    %c0_i32_0 = arith.constant 0 : i32
    %c0_i32_1 = arith.constant 0 : i32
    return %c0_i32, %c0_i32_0 : i32, i32
  }
  func.func @transform_4(%arg0: i32, %arg1: i32) -> (i32, i32) {
    %c0_i32 = arith.constant 0 : i32
    %c0_i32_0 = arith.constant 0 : i32
    %c0_i32_1 = arith.constant 0 : i32
    return %c0_i32, %c0_i32_0 : i32, i32
  }
  func.func @transform_5(%arg0: i32, %arg1: i32) -> (i32, i32) {
    %c0_i32 = arith.constant 0 : i32
    %c0_i32_0 = arith.constant 0 : i32
    %c0_i32_1 = arith.constant 0 : i32
    return %c0_i32, %c0_i32_0 : i32, i32
  }
  func.func @transform_6(%arg0: i32, %arg1: i32) -> (i32, i32, i32) {
    %c0_i32 = arith.constant 0 : i32
    %c0_i32_0 = arith.constant 0 : i32
    %c0_i32_1 = arith.constant 0 : i32
    return %arg1, %c0_i32, %c0_i32_0 : i32, i32, i32
  }
  func.func @transform_7(%arg0: i32, %arg1: i32) -> (i32, i32, i32) {
    %c0_i32 = arith.constant 0 : i32
    %c0_i32_0 = arith.constant 0 : i32
    %c0_i32_1 = arith.constant 0 : i32
    return %arg1, %c0_i32, %c0_i32_0 : i32, i32, i32
  }
  func.func @transform_8(%arg0: i32, %arg1: i32) -> (i32, i32, i32) {
    %c0_i32 = arith.constant 0 : i32
    %c0_i32_0 = arith.constant 0 : i32
    %c0_i32_1 = arith.constant 0 : i32
    return %arg1, %c0_i32, %c0_i32_0 : i32, i32, i32
  }
  func.func @transform_9(%arg0: i32, %arg1: i32) -> (i32, i32, i32) {
    %c0_i32 = arith.constant 0 : i32
    %c0_i32_0 = arith.constant 0 : i32
    %c0_i32_1 = arith.constant 0 : i32
    return %arg1, %c0_i32, %c0_i32_0 : i32, i32, i32
  }
  func.func @transform_10(%arg0: i32, %arg1: i32) -> (i32, i32, i32) {
    %c0_i32 = arith.constant 0 : i32
    %c0_i32_0 = arith.constant 0 : i32
    %c0_i32_1 = arith.constant 0 : i32
    return %arg1, %c0_i32, %c0_i32_0 : i32, i32, i32
  }
  func.func @transform_11(%arg0: i32, %arg1: i32) -> (i32, i32, i32) {
    %c0_i32 = arith.constant 0 : i32
    %c0_i32_0 = arith.constant 0 : i32
    %c0_i32_1 = arith.constant 0 : i32
    return %arg1, %c0_i32, %c0_i32_0 : i32, i32, i32
  }
  func.func @transform_12(%arg0: i32, %arg1: i32) -> (i32, i32, i32) {
    %c0_i32 = arith.constant 0 : i32
    %c0_i32_0 = arith.constant 0 : i32
    %c0_i32_1 = arith.constant 0 : i32
    return %arg1, %c0_i32, %c0_i32_0 : i32, i32, i32
  }
  func.func @transform_13(%arg0: i32, %arg1: i32) -> (i32, i32, i32) {
    %c0_i32 = arith.constant 0 : i32
    %c0_i32_0 = arith.constant 0 : i32
    %c0_i32_1 = arith.constant 0 : i32
    return %arg0, %c0_i32, %c0_i32_0 : i32, i32, i32
  }
}

</mosaic_0001>

<bundles_post_ra>
// kernel: text_encoder_forward.1
= control target key start
LH: loop header
LB: loop body
LE: loop exit
PB: predicated region body
PF: predicated region fallthrough
CT: control target
= control target key end

     0   :  { %s2701_s0 = inlined_call_operand.vmem [shape: s32[2,8,1], index: 0, kind: input, shape index: {}]   ;;  %s2702_s1 = inlined_call_operand.vmem [shape: f32[2,1,8], index: 1, kind: input, shape index: {}]   ;;  %s2703_s2 = inlined_call_operand.vmem [shape: f32[8,8], index: 2, kind: input, shape index: {}]   ;;  %s2704_s3 = inlined_call_operand.vmem [shape: f32[8,8], index: 3, kind: input, shape index: {}]   ;;  %s2705_s4 = inlined_call_operand.vmem [shape: f32[128,32], index: 4, kind: input, shape index: {}]   ;;  %s2706_s5 = inlined_call_operand.vmem [shape: f32[1,32], index: 5, kind: input, shape index: {}]   ;;  %s2707_s6 = inlined_call_operand.vmem [shape: f32[2,1,32], index: 6, kind: input, shape index: {}]   ;;  %s2708_s7 = inlined_call_operand.vmem [shape: bf16[2,32,64], index: 7, kind: input, shape index: {}]   ;;  %s2709_s8 = inlined_call_operand.vmem [shape: f32[2,1,64], index: 8, kind: input, shape index: {}]   ;;  %s2710_s9 = inlined_call_operand.vmem [shape: bf16[2,32,32], index: 9, kind: input, shape index: {}]   ;;  %s2711_s10 = inlined_call_operand.vmem [shape: f32[2,1,32], index: 10, kind: input, shape index: {}]   ;;  %s2712_s11 = inlined_call_operand.vmem [shape: bf16[2,32,128], index: 11, kind: input, shape index: {}]   ;;  %s2713_s12 = inlined_call_operand.vmem [shape: bf16[2,64,32], index: 12, kind: input, shape index: {}]   ;;  %s2714_s13 = inlined_call_operand.hbm [shape: f32[2,8,32], index: 13, kind: output, shape index: {}]  }
   0x1   :  { %2729 = sst [smem:[#allocation18_spill]] %s2703_s2 }
   0x2   :  { %2730 = sst [smem:[#allocation19_spill]] %s2704_s3 }
   0x3   :  { %2731 = sst [smem:[#allocation20_spill]] %s2706_s5 }
   0x4   :  { %2732 = sst [smem:[#allocation21_spill]] %s2714_s13 }
   0x5   :  { %18 = vsyncpa [#allocation4], 0 }
   0x6   :  { %20 = vsyncpa [#allocation4 + $0x1], 0  ;;  %s2309_s25 = smov 0   ;;  %s2311_s26 = smov 0  }
   0x7   :  { %s2313_s27 = smov 0   ;;  %s2315_s28 = smov 0  }
   0x8   :  { %s2317_s29 = smov 0   ;;  %s2319_s30 = smov 0  }
   0x9   :  { %s2321_s14 = smov 0   ;;  %s2323_s15 = smov 0  }
   0xa LB: > { %2733 = sst [smem:[#allocation6_spill]] %s2185_s25  ;;  %s1744_s16 = sadd.s32 4294967295, %s2213_s15   ;;  %s2213_s15 = sphi %s2323_s15, %s26_s15   ;;  %s2209_s14 = sphi %s2321_s14, %s2767_s14   ;;  %s2205_s30 = sphi %s2319_s30, %s2766_s30   ;;  %s2201_s29 = sphi %s2317_s29, %s2765_s29   ;;  %s2197_s28 = sphi %s2315_s28, %s2764_s28   ;;  %s2193_s27 = sphi %s2313_s27, %s2763_s27   ;;  %s2189_s26 = sphi %s2311_s26, %s2762_s26   ;;  %s2185_s25 = sphi %s2309_s25, %s2761_s25  }
   0xb   : > { %2734 = sst [smem:[#allocation7_spill]] %s2189_s26  ;;  %s1745_s17 = sadd.s32 4294967294, %s2213_s15  }
   0xc   : > { %2735 = sst [smem:[#allocation8_spill]] %s2193_s27  ;;  %s35_s18 = sadd.s32 1, %s2205_s30 }
   0xd   : > { %2736 = sst [smem:[#allocation9_spill]] %s2201_s29  ;;  %p36_p0 = scmp.ge.s32.totalorder %s35_s18, 2 }
   0xe   : > { %2737 = sst [smem:[#allocation10_spill]] %s2205_s30  ;;  %s38_s19 = sadd.s32 1, %s2209_s14 }
   0xf   : > { %2738 = sst [smem:[#allocation11_spill]] %s2209_s14  ;;  %p373_p1 = scmp.ne.s32.totalorder %s2193_s27, %s2189_s26 }
  0x10   : > { %2739 = sst [smem:[#allocation12_spill]] %s2213_s15  ;;  %p374_p2 = scmp.eq.s32.totalorder %s1744_s16, 3 }
  0x11   : > { %s2769_s18 = smov (%p36_p0, %s35_s18), 0  ;;  %s2771_s19 = smov (!%p36_p0, %s38_s19), %s2209_s14 }
  0x12   : > { %2740 = sst [smem:[#allocation13_spill]] %s2769_s18  ;;  %p2358_p3 = por %p374_p2, %p373_p1 }
  0x13   : > { %p379_p4 = scmp.ne.s32.totalorder %s2189_s26, %s2185_s25  ;;  %p40_p5 = scmp.ge.s32.totalorder %s2771_s19, 2 }
  0x14   : > { %s2741_s20 = scalar_select %p2358_p3, 1, 0 }
  0x15   : > { %p380_p6 = scmp.eq.s32.totalorder %s1745_s17, 3  ;;  %p1748_p7 = scmp.ge.s32.totalorder %s2213_s15, 1 }
  0x16   : > { %2742 = sst [smem:[#allocation14_spill]] %s2741_s20  ;;  %p473_p8 = scmp.lt.s32.totalorder %s2213_s15, 5 }
  0x17   : > { %s2773_s19 = smov (%p40_p5, %s2771_s19), 0  ;;  %p2368_p9 = por %p380_p6, %p379_p4 }
  0x18   : > { %2743 = sst [smem:[#allocation15_spill]] %s2773_s19  ;;  %p474_p10 = pnand %p1748_p7, %p473_p8 }
  0x19   : > { %s2744_s21 = scalar_select %p2368_p9, 1, 0 }
  0x1a   : > { %s360_s22 = ssub.s32 %s2209_s14, %s2773_s19  ;;  %s363_s23 = sadd.s32 1, %s2193_s27 }
  0x1b   : > { %2745 = sst [smem:[#allocation16_spill]] %s2744_s21  ;;  %p361_p11 = scmp.eq.s32.totalorder %s360_s22, 0 }
  0x1c   : > { %477 = sbr.rel (%p474_p10) target bundleno = 3237 (0xca5), region = 72  ;;  %s2718_s16 = sand.u32 (!%p474_p10), 1, %s2189_s26  }
  0x1d   : > { %s2376_s24 = scalar_select %p361_p11, %s2193_s27, %s363_s23  }
  0x1e   : > { %p548_p12 = scmp.lt.s32.totalorder (!%p474_p10), %s2201_s29, 1  ;;  %s2382_s17 = sshll.u32 (!%p474_p10), %s2718_s16, 3 }
  0x1f   : > { %2746 = sst [smem:[#allocation17_spill]] %s2376_s24  ;;  %p555_p13 = scmp.lt.s32.totalorder (!%p474_p10), %s2197_s28, 1 }
  0x20   : > { %s547_s5 = scalar_lea.vmem (!%p474_p10), [#allocation3], %s2382_s17  ;;  %p1759_p0 = scmp.ne.s32.totalorder (!%p474_p10), %s2197_s28, 0 }
  0x23   : > { %s2386_s18 = scalar_select %p548_p12, %s2201_s29, 1 }
  0x24   : > { %s2389_s22 = scalar_select %p555_p13, %s2197_s28, 1 }
  0x25   : > { %s1750_s23 = sshll.u32 %s2386_s18, 3  ;;  %588 = sbr.rel (%p1759_p0) target bundleno = 382 (0x17e), region = 76  ;;  %v598_v1 = vld [vmem:[%s2705_s4] sm:$0xff] (!%p1759_p0)  ;;  %v599_v2 = vld [vmem:[%s2705_s4 + $0x8] sm:$0xff] (!%p1759_p0)  ;;  %v2215_v3 = vmov (!%p1759_p0), 0   ;;  %v2216_v4 = vmov (!%p1759_p0), 0.0|0.0   ;;  %v590_v28 = vlaneseq (!%p1759_p0) }
  0x26   : > { %s551_s27 = scalar_lea.vmem %s2701_s0, %s1750_s23  ;;  %s1794_s13 = sshll.u32 %s2389_s22, 4  ;;  %2082 = vset.pattern.permute.xlu0 (!%p1759_p0), %v2215_v3  ;;  %1964 = vmatprep.subr.bf16.mxu0 (!%p1759_p0), %v2216_v4  ;;  %v1965_v5 = vpack.c.bf16 (!%p1759_p0), %v599_v2, %v598_v1  ;;  %v600_v6 = vld [vmem:[%s2705_s4 + $0x10] sm:$0xff] (!%p1759_p0)  ;;  %v601_v7 = vld [vmem:[%s2705_s4 + $0x18] sm:$0xff] (!%p1759_p0)  ;;  %vm2217_vm0 = vmmov (!%p1759_p0), 0   ;;  %v2218_v8 = vmov (!%p1759_p0), 0.0   ;;  %v602_v10 = vld [vmem:[%s2705_s4 + $0x20] sm:$0xff] (!%p1759_p0) }
  0x27   : > { %s2411_s2 = scalar_lea.vmem %s2708_s7, %s1794_s13  ;;  %s2416_s30 = scalar_lea.vmem %s2710_s9, %s1794_s13  ;;  %v589_v0 = vld [vmem:[%s551_s27] sm:$0xff] (!%p1759_p0)  ;;  %1877 = vmatprep.mubr.msk.f32.mxu0 (!%p1759_p0), %vm2217_vm0, %v2218_v8  ;;  %v1968_v9 = vpack.c.bf16 (!%p1759_p0), %v601_v7, %v600_v6  ;;  %v603_v11 = vld [vmem:[%s2705_s4 + $0x28] sm:$0xff] (!%p1759_p0)  ;;  %v604_v13 = vld [vmem:[%s2705_s4 + $0x30] sm:$0xff] (!%p1759_p0)  ;;  %v591_v29 = vand.u32 (!%p1759_p0), 127, %v590_v28  ;;  %v2219_v31 = vmov (!%p1759_p0), 1.0   ;;  %vm684_vm2 = vcmask (!%p1759_p0), 261120  }
  0x28   : > { %s573_s25 = scalar_lea.vmem %s2711_s10, %s2389_s22  ;;  %s2425_s15 = scalar_lea.vmem %s2712_s11, %s1794_s13  ;;  %593 = vperm.xlu0 (!%p1759_p0), %2082, %v589_v0   ;;  %1966 = vmatpush3.bf16.msra.mxu0 (!%p1759_p0), %v1965_v5  ;;  %v1971_v12 = vpack.c.bf16 (!%p1759_p0), %v603_v11, %v602_v10  ;;  %v605_v14 = vld [vmem:[%s2705_s4 + $0x38] sm:$0xff] (!%p1759_p0)  ;;  %v606_v16 = vld [vmem:[%s2705_s4 + $0x40] sm:$0xff] (!%p1759_p0)  ;;  %v607_v17 = vld [vmem:[%s2705_s4 + $0x48] sm:$0xff] (!%p1759_p0) }
  0x29   : > { %s1797_s26 = sshll.u32 %s2389_s22, 5  ;;  %1967 = vmatprep.subr.bf16.mxu0 (!%p1759_p0), %v2216_v4  ;;  %v1974_v15 = vpack.c.bf16 (!%p1759_p0), %v605_v14, %v604_v13  ;;  %v1977_v18 = vpack.c.bf16 (!%p1759_p0), %v607_v17, %v606_v16  ;;  %v608_v19 = vld [vmem:[%s2705_s4 + $0x50] sm:$0xff] (!%p1759_p0)  ;;  %v609_v20 = vld [vmem:[%s2705_s4 + $0x58] sm:$0xff] (!%p1759_p0)  ;;  %v610_v22 = vld [vmem:[%s2705_s4 + $0x60] sm:$0xff] (!%p1759_p0) }
  0x2a   : > { %s2431_s3 = scalar_lea.vmem %s2713_s12, %s1797_s26  ;;  %v1980_v21 = vpack.c.bf16 (!%p1759_p0), %v609_v20, %v608_v19  ;;  %v611_v23 = vld [vmem:[%s2705_s4 + $0x68] sm:$0xff] (!%p1759_p0)  ;;  %v612_v25 = vld [vmem:[%s2705_s4 + $0x70] sm:$0xff] (!%p1759_p0)  ;;  %v613_v26 = vld [vmem:[%s2705_s4 + $0x78] sm:$0xff] (!%p1759_p0) }
  0x2b   : > { %v1983_v24 = vpack.c.bf16 (!%p1759_p0), %v611_v23, %v610_v22  ;;  %v1986_v27 = vpack.c.bf16 (!%p1759_p0), %v613_v26, %v612_v25 }
  0x2c   : > { %1969 = vmatpush3.bf16.msra.mxu0 %v1968_v9 }
  0x2d   : > { %1970 = vmatprep.subr.bf16.mxu0 %v2216_v4 }
  0x30   : > { %1972 = vmatpush3.bf16.msra.mxu0 %v1971_v12 }
  0x31   : > { %1973 = vmatprep.subr.bf16.mxu0 %v2216_v4 }
  0x34   : > { %1975 = vmatpush3.bf16.msra.mxu0 %v1974_v15 }
  0x35   : > { %1976 = vmatprep.subr.bf16.mxu0 %v2216_v4 }
  0x38   : > { %1978 = vmatpush3.bf16.msra.mxu0 %v1977_v18 }
  0x39   : > { %1979 = vmatprep.subr.bf16.mxu0 %v2216_v4 }
  0x3c   : > { %1981 = vmatpush3.bf16.msra.mxu0 %v1980_v21 }
  0x3d   : > { %1982 = vmatprep.subr.bf16.mxu0 %v2216_v4 }
  0x40   : > { %1984 = vmatpush3.bf16.msra.mxu0 %v1983_v24 }
  0x41   : > { %1985 = vmatprep.subr.bf16.mxu0 %v2216_v4 }
  0x44   : > { %1987 = vmatpush3.bf16.msra.mxu0 %v1986_v27 }
  0xa7   : > { %v594_v30 = vpop.permute.xlu0 %593 }
  0xa8   : > { %vm595_vm1 = vcmp.eq.s32.totalorder %v591_v29, %v594_v30 }
  0xa9   : > { %1878 = vmatmul.mubr.msk.f32.vlgmr.msra.gmra.mrb[0].mxu0 %vm595_vm1, %v2219_v31 }
 0x17c   : > { %v680_v32 = vpop.f32.mrb[0].mxu0 }
 0x17d   : > { %685 = vst.msk [vmem:[#allocation2] sm:$0xff] %vm684_vm2, %v680_v32  ;;  %v1879_v33 = vpop.f32.mrb[1].mxu0 }
 0x17e PF: > { %vm706_vm3 = vcmask 261120   ;;  %v2083_v37 = vld [vmem:[%s2411_s2] sm:$0xff]   ;;  %v2220_v38 = vmov 0.0   ;;  %vm2221_vm4 = vmmov 0   ;;  %v2084_v39 = vld [vmem:[%s2411_s2 + $0x8] sm:$0xff]   ;;  %s2747_s2 = scalar_lea.vmem %s2707_s6, %s2389_s22  ;;  %s2748_s16 = scalar_lea.vmem %s2709_s8, %s2389_s22  ;;  %vm831_vm5 = vcmask 31744  }
 0x17f   : > { %1880 = vmatprep.subr.bf16.mxu0 %v2220_v38  ;;  %1884 = vmatprep.mubr.msk.bf16.mxu0 %vm2221_vm4, %v2220_v38  ;;  %v1762_v44 = vld [vmem:[%s2747_s2] ss:$0 sm:$0xff]  ;;  %s2222_s13 = smov 100   ;;  %s2223_s29 = smov 120   ;;  %vm893_vm6 = vcmask 64512   ;;  %vm1131_vm11 = vcmask 1043456  }
 0x180   : > { %1881 = vmatpush3.bf16.msra.mxu0 %v2083_v37  ;;  %1888 = vmatprep.subr.bf16.mxu1 %v2220_v38  ;;  %v1763_v48 = vld [vmem:[%s2748_s16] ss:$0 sm:$0xff]  ;;  %s2224_s21 = smov 112   ;;  %s2225_s23 = smov 92   ;;  %vm1323_vm12 = vcmask 130048   ;;  %vm1325_vm13 = vcmask 195584  }
 0x181   : > { %1882 = vmatprep.subr.bf16.mxu0 %v2220_v38  ;;  %1890 = vmatprep.mubr.msk.bf16.mxu1 %vm2221_vm4, %v2220_v38  ;;  %s2226_s27 = smov 124   ;;  %s2749_s14 = sld [smem:[#allocation18_spill]]  ;;  %vm1509_vm14 = vcmask 523264  }
 0x182   : > { %s2750_s24 = sld [smem:[#allocation19_spill]]  ;;  %s2227_s16 = smov 32  }
 0x183   : > { %s2751_s26 = scalar_lea.vmem %s2702_s1, %s2386_s18  ;;  %s2233_s18 = smov 80  }
 0x184   : > { %v2483_v34 = vld [vmem:[#allocation2] sm:$0xff]  ;;  %1883 = vmatpush3.bf16.msra.mxu0 %v2084_v39  ;;  %s2234_s20 = smov 8   ;;  %p1788_p1 = scmp.ne.s32.totalorder %s2197_s28, 1 }
 0x185   : > { %v705_v35 = vmul.f32 %v2483_v34, %v2483_v34  ;;  %1894 = vmatprep.subr.bf16.mxu0 %v2220_v38 }
 0x187   : > { %v707_v36 = vsel %vm706_vm3, %v705_v35, 0.0  ;;  %v2527_v59 = vld [vmem:[%s2749_s14] sm:$0xff]  ;;  %s2235_s14 = smov 16  }
 0x188   : > { %708 = vadd.xlane.f32.xlu0 %v707_v36  ;;  %v2532_v60 = vld [vmem:[%s2750_s24] sm:$0xff] }
 0x215   : > { %v709_v40 = vpop.xlane.xlu0 %708 }
 0x216   : > { %v711_v41 = vmul.f32 0.03125, %v709_v40 }
 0x218   : > { %v712_v42 = vadd.f32 1e-06, %v711_v41 }
 0x21a   : > { %2093 = vrsqrt.f32 %v712_v42 }
 0x224   : > { %v2094_v43 = vpop.eup %2093 }
 0x225   : > { %v714_v45 = vmul.f32 %v2094_v43, %v2483_v34 }
 0x227   : > { %v721_v46 = vmul.f32 %v1762_v44, %v714_v45 }
 0x229   : > { %v722_v47 = vpack.c.bf16 %v721_v46, %v721_v46 }
 0x22b   : > { %1885 = vmatmul.mubr.msk.bf16.vlgmr.msra.gmra.mrb[0].mxu0 %vm706_vm3, %v722_v47 }
 0x22c   : > { %1896 = vmatprep.mubr.msk.bf16.mxu0 %vm2221_vm4, %v2220_v38 }
 0x2fe   : > { %v783_v49 = vpop.f32.mrb[0].mxu0 }
 0x2ff   : > { %v2512_v50 = vadd.f32 %v1763_v48, %v783_v49  ;;  %v1886_v51 = vpop.f32.mrb[1].mxu0 }
 0x300   : > { %v786_v52 = vpop.f32.mrb[2].mxu0 }
 0x301   : > { %858 = vrot.lane.b32.xlu1 %v2512_v50, %s2222_s13  ;;  %790 = vrot.lane.b32.xlu0 %v2512_v50, %s2223_s29  ;;  %v1887_v53 = vpop.f32.mrb[3].mxu0  ;;  %v799_v54 = vsub.f32 0.0, %v2512_v50  ;;  %s2229_s29 = smov 4   ;;  %v836_v21 = vmul.f32 %v2512_v50, %v2527_v59 }
 0x305   : > { %793 = vrot.lane.b32.xlu0 %v2512_v50, %s2224_s21  ;;  %852 = vrot.lane.b32.xlu1 %v799_v54, %s2225_s23  ;;  %s2230_s21 = smov 96  }
 0x309   : > { %807 = vrot.lane.b32.xlu0 %v799_v54, %s2226_s27 }
 0x373   : > { %v2519_v55 = vpop.permute.xlu0 %790  ;;  %v859_v56 = vpop.permute.xlu1 %858 }
 0x374   : > { %v800_v57 = vsub.f32 0.0, %v2519_v55  ;;  %v837_v28 = vmul.f32 %v2519_v55, %v2527_v59 }
 0x376   : > { %809 = vrot.lane.b32.xlu0 %v800_v57, %s2226_s27  ;;  %854 = vrot.lane.b32.xlu1 %v800_v57, %s2225_s23  ;;  %v687_v57 = vld [vmem:[%s2751_s26] sm:$0x1] }
 0x377   : > { %v853_v58 = vpop.permute.xlu1 %852  ;;  %v794_v8 = vpop.permute.xlu0 %793  ;;  %vm693_vm7 = vcmp.gt.f32.partialorder %v687_v57, 0.5 }
 0x378   : > { %v864_v61 = vsel %vm831_vm5, %v853_v58, %v859_v56  ;;  %v801_v9 = vsub.f32 0.0, %v794_v8  ;;  %v838_v43 = vmul.f32 %v794_v8, %v2527_v59  ;;  %v688_v56 = vlaneseq }
 0x379   : > { %v872_v62 = vmul.f32 %v864_v61, %v2532_v60 }
 0x37a   : > { %860 = vrot.lane.b32.xlu1 %v2519_v55, %s2222_s13  ;;  %s2228_s13 = smov 104   ;;  %v689_v58 = vshrl.u32 %v688_v56, 7 }
 0x37b   : > { %v808_v11 = vpop.permute.xlu0 %807 }
 0x37e   : > { %867 = vrot.lane.b32.xlu1 %v2527_v59, %s2227_s16 }
 0x382   : > { %876 = vrot.lane.b32.xlu1 %v872_v62, %s2227_s16  ;;  %v691_v62 = vand.u32 127, %v688_v56 }
 0x384   : > { %vm692_vm8 = vcmp.ge.s32.totalorder %v689_v58, %v691_v62 }
 0x3e8   : > { %v855_v63 = vpop.permute.xlu1 %854  ;;  %v810_v14 = vpop.permute.xlu0 %809 }
 0x3ec   : > { %v861_v0 = vpop.permute.xlu1 %860 }
 0x3ed   : > { %v865_v1 = vsel %vm831_vm5, %v855_v63, %v861_v0  ;;  %v2232_v0 = vmov -1e+09  }
 0x3ee   : > { %v873_v2 = vmul.f32 %v865_v1, %v2532_v60 }
 0x3f0   : > { %878 = vrot.lane.b32.xlu1 %v873_v2, %s2227_s16  ;;  %v868_v3 = vpop.permute.xlu1 %867 }
 0x3f1   : > { %v870_v4 = vmul.f32 %v868_v3, %v2512_v50  ;;  %v871_v12 = vmul.f32 %v868_v3, %v2519_v55 }
 0x3f4   : > { %796 = vrot.lane.b32.xlu1 %v2512_v50, %s2228_s13  ;;  %v877_v5 = vpop.permute.xlu1 %876 }
 0x3f5   : > { %v882_v6 = vadd.f32 %v877_v5, %v870_v4 }
 0x3f7   : > { %v888_v7 = vpack.c.bf16 %v882_v6, %v882_v6 }
 0x3f8   : > { %819 = vrot.lane.b32.xlu1 %v2512_v50, %s2229_s29 }
 0x3f9   : > { %891 = vrot.lane.b32.xlu0 %v888_v7, %s2230_s21 }
 0x3fc   : > { %821 = vrot.lane.b32.xlu1 %v2519_v55, %s2229_s29 }
 0x3fd   : > { %823 = vrot.lane.b32.xlu0 %v794_v8, %s2229_s29 }
 0x400   : > { %811 = vrot.lane.b32.xlu1 %v801_v9, %s2226_s27 }
 0x462   : > { %v879_v10 = vpop.permute.xlu1 %878 }
 0x463   : > { %v883_v16 = vadd.f32 %v879_v10, %v871_v12 }
 0x465   : > { %v889_v20 = vpack.c.bf16 %v883_v16, %v883_v16 }
 0x466   : > { %v797_v13 = vpop.permute.xlu1 %796 }
 0x467   : > { %v802_v15 = vsub.f32 0.0, %v797_v13  ;;  %825 = vrot.lane.b32.xlu0 %v797_v13, %s2229_s29  ;;  %v839_v44 = vmul.f32 %v797_v13, %v2527_v59  ;;  %v697_v59 = vsub.s32 0, %v689_v58 }
 0x469   : > { %813 = vrot.lane.b32.xlu1 %v802_v15, %s2226_s27 }
 0x46a   : > { %v820_v17 = vpop.permute.xlu1 %819 }
 0x46b   : > { %v832_v18 = vsel %vm831_vm5, %v808_v11, %v820_v17  ;;  %v892_v19 = vpop.permute.xlu0 %891 }
 0x46c   : > { %v840_v22 = vmul.f32 %v832_v18, %v2532_v60  ;;  %v898_v23 = vsel %vm893_vm6, %v892_v19, 0 }
 0x46d   : > { %1889 = vmatpush3.bf16.xpose.msra.mxu1 %v898_v23  ;;  %1895 = vmatpush3.bf16.xpose.msra.mxu0 %v898_v23 }
 0x46e   : > { %v844_v24 = vadd.f32 %v840_v22, %v836_v21  ;;  %984 = vrot.lane.b32.xlu1 %v889_v20, %s2230_s21  ;;  %v822_v25 = vpop.permute.xlu1 %821  ;;  %1900 = vmatprep.subr.bf16.mxu1 %v2220_v38 }
 0x46f   : > { %v833_v26 = vsel %vm831_vm5, %v810_v14, %v822_v25  ;;  %1906 = vmatprep.subr.bf16.mxu0 %v2220_v38  ;;  %v824_v36 = vpop.permute.xlu0 %823 }
 0x470   : > { %v848_v27 = vmul.f32 0.35355338, %v844_v24  ;;  %v841_v29 = vmul.f32 %v833_v26, %v2532_v60 }
 0x472   : > { %v884_v30 = vpack.c.bf16 %v848_v27, %v848_v27  ;;  %v845_v31 = vadd.f32 %v841_v29, %v837_v28  ;;  %v812_v35 = vpop.permute.xlu1 %811 }
 0x473   : > { %v834_v37 = vsel %vm831_vm5, %v812_v35, %v824_v36 }
 0x474   : > { %v849_v32 = vmul.f32 0.35355338, %v845_v31  ;;  %1891 = vmatmul.mubr.msk.bf16.vlgmr.msra.gmra.mrb[0].mxu1 %vm893_vm6, %v884_v30  ;;  %v842_v39 = vmul.f32 %v834_v37, %v2532_v60 }
 0x475   : > { %1902 = vmatprep.mubr.msk.bf16.mxu1 %vm2221_vm4, %v2220_v38 }
 0x476   : > { %v885_v33 = vpack.c.bf16 %v849_v32, %v849_v32  ;;  %v846_v46 = vadd.f32 %v842_v39, %v838_v43 }
 0x478   : > { %1897 = vmatmul.mubr.msk.bf16.vlgmr.msra.gmra.mrb[4].mxu0 %vm893_vm6, %v885_v33  ;;  %v850_v51 = vmul.f32 0.35355338, %v846_v46 }
 0x479   : > { %1908 = vmatprep.mubr.msk.bf16.mxu0 %vm2221_vm4, %v2220_v38 }
 0x47a   : > { %v886_v53 = vpack.c.bf16 %v850_v51, %v850_v51 }
 0x4d9   : > { %v826_v40 = vpop.permute.xlu0 %825 }
 0x4db   : > { %v814_v41 = vpop.permute.xlu1 %813 }
 0x4dc   : > { %v835_v42 = vsel %vm831_vm5, %v814_v41, %v826_v40 }
 0x4dd   : > { %v843_v45 = vmul.f32 %v835_v42, %v2532_v60  ;;  %v2231_v60 = vmov 0  }
 0x4de   : > { %v694_v61 = vsel %vm693_vm7, 1, %v2231_v60 }
 0x4df   : > { %v847_v47 = vadd.f32 %v843_v45, %v839_v44  ;;  %v698_v63 = vrot.slane %v694_v61, %v697_v59 }
 0x4e0   : > { %v985_v48 = vpop.permute.xlu1 %984 }
 0x4e1   : > { %v990_v49 = vsel %vm893_vm6, %v985_v48, 0  ;;  %v851_v52 = vmul.f32 0.35355338, %v847_v47  ;;  %vm699_vm9 = vcmp.eq.s32.totalorder %v698_v63, 1  ;;  %v1123_v48 = vpack.c.bf16 %v2512_v50, %v2512_v50 }
 0x4e2   : > { %1901 = vmatpush3.bf16.xpose.msra.mxu1 %v990_v49  ;;  %1907 = vmatpush3.bf16.xpose.msra.mxu0 %v990_v49  ;;  %vm700_vm10 = vmand %vm692_vm8, %vm699_vm9  ;;  %v1124_v49 = vpack.c.bf16 %v2519_v55, %v2519_v55 }
 0x4e3   : > { %1912 = vmatprep.subr.bf16.mxu1 %v2220_v38  ;;  %1918 = vmatprep.subr.bf16.mxu0 %v2220_v38  ;;  %v887_v54 = vpack.c.bf16 %v851_v52, %v851_v52  ;;  %v701_v1 = vsel %vm700_vm10, 0.0, %v2232_v0 }
 0x4e9   : > { %1903 = vmatmul.mubr.msk.bf16.vlgmr.msra.gmra.mrb[4].mxu1 %vm893_vm6, %v886_v53  ;;  %1909 = vmatmul.mubr.msk.bf16.vlgmr.msra.gmra.mrb[8].mxu0 %vm893_vm6, %v887_v54 }
 0x4ea   : > { %1914 = vmatprep.mubr.msk.bf16.mxu1 %vm2221_vm4, %v2220_v38  ;;  %1920 = vmatprep.mubr.msk.bf16.mxu0 %vm2221_vm4, %v2220_v38 }
 0x547   : > { %v934_v2 = vpop.f32.mrb[0].mxu1 }
 0x548   : > { %v935_v3 = vadd.f32 %v934_v2, %v701_v1  ;;  %v1892_v4 = vpop.f32.mrb[1].mxu1 }
 0x549   : > { %v937_v5 = vpop.f32.mrb[2].mxu1 }
 0x54a   : > { %v1893_v6 = vpop.f32.mrb[3].mxu1  ;;  %v1075_v7 = vsel %vm893_vm6, %v935_v3, -inf }
 0x54b   : > { %1076 = vmax.xlane.f32.xlu0 %v1075_v7  ;;  %v977_v8 = vpop.f32.mrb[4].mxu0  ;;  %v2085_v6 = vld [vmem:[%s2416_s30] sm:$0xff]   ;;  %v2086_v7 = vld [vmem:[%s2416_s30 + $0x8] sm:$0xff]   ;;  %s2236_s30 = smov 24  }
 0x54c   : > { %v978_v9 = vadd.f32 %v977_v8, %v701_v1  ;;  %v1898_v10 = vpop.f32.mrb[5].mxu0 }
 0x54d   : > { %v980_v11 = vpop.f32.mrb[6].mxu0 }
 0x54e   : > { %v1899_v12 = vpop.f32.mrb[7].mxu0  ;;  %v1078_v13 = vsel %vm893_vm6, %v978_v9, -inf }
 0x54f   : > { %1079 = vmax.xlane.f32.xlu1 %v1078_v13 }
 0x5bc   : > { %v1026_v14 = vpop.f32.mrb[4].mxu1  ;;  %v1069_v15 = vpop.f32.mrb[8].mxu0 }
 0x5bd   : > { %v1027_v16 = vadd.f32 %v1026_v14, %v701_v1  ;;  %v1904_v17 = vpop.f32.mrb[5].mxu1  ;;  %v1910_v18 = vpop.f32.mrb[9].mxu0  ;;  %v1070_v21 = vadd.f32 %v1069_v15, %v701_v1 }
 0x5be   : > { %v1029_v19 = vpop.f32.mrb[6].mxu1  ;;  %v1072_v20 = vpop.f32.mrb[10].mxu0 }
 0x5bf   : > { %v1905_v22 = vpop.f32.mrb[7].mxu1  ;;  %v1911_v23 = vpop.f32.mrb[11].mxu0  ;;  %v1081_v24 = vsel %vm893_vm6, %v1027_v16, -inf  ;;  %v1084_v25 = vsel %vm893_vm6, %v1070_v21, -inf }
 0x5c0   : > { %1082 = vmax.xlane.f32.xlu0 %v1081_v24 }
 0x5c4   : > { %1085 = vmax.xlane.f32.xlu0 %v1084_v25 }
 0x5d8   : > { %v1077_v26 = vpop.xlane.xlu0 %1076 }
 0x5d9   : > { %v1087_v27 = vsub.f32 %v935_v3, %v1077_v26 }
 0x5db   : > { %v1091_v28 = vmul.f32 1.442695, %v1087_v27 }
 0x5dc   : > { %v1080_v29 = vpop.xlane.xlu1 %1079 }
 0x5dd   : > { %2095 = vpow2.f32 %v1091_v28  ;;  %v1088_v30 = vsub.f32 %v978_v9, %v1080_v29 }
 0x5df   : > { %v1093_v31 = vmul.f32 1.442695, %v1088_v30 }
 0x5e1   : > { %2097 = vpow2.f32 %v1093_v31 }
 0x5e7   : > { %v2096_v32 = vpop.eup %2095 }
 0x5e8   : > { %v1099_v33 = vsel %vm893_vm6, %v2096_v32, 0.0 }
 0x5e9   : > { %1100 = vadd.xlane.f32.xlu1 %v1099_v33 }
 0x5eb   : > { %v2098_v35 = vpop.eup %2097 }
 0x5ec   : > { %v1102_v36 = vsel %vm893_vm6, %v2098_v35, 0.0 }
 0x5ed   : > { %1103 = vadd.xlane.f32.xlu0 %v1102_v36 }
 0x64d   : > { %v1083_v37 = vpop.xlane.xlu0 %1082 }
 0x64e   : > { %v1089_v39 = vsub.f32 %v1027_v16, %v1083_v37 }
 0x650   : > { %v1095_v40 = vmul.f32 1.442695, %v1089_v39 }
 0x651   : > { %v1086_v41 = vpop.xlane.xlu0 %1085 }
 0x652   : > { %2099 = vpow2.f32 %v1095_v40  ;;  %v1090_v42 = vsub.f32 %v1070_v21, %v1086_v41  ;;  %v2087_v40 = vld [vmem:[%s2425_s15] sm:$0xff]   ;;  %v2088_v41 = vld [vmem:[%s2425_s15 + $0x8] sm:$0xff]   ;;  %s2237_s15 = smov 64  }
 0x654   : > { %v1097_v43 = vmul.f32 1.442695, %v1090_v42 }
 0x656   : > { %2101 = vpow2.f32 %v1097_v43 }
 0x65c   : > { %v2100_v44 = vpop.eup %2099 }
 0x65d   : > { %v1105_v45 = vsel %vm893_vm6, %v2100_v44, 0.0 }
 0x65e   : > { %1106 = vadd.xlane.f32.xlu1 %v1105_v45  ;;  %v1778_v45 = vld [vmem:[%s573_s25] ss:$0 sm:$0xff] }
 0x660   : > { %v2102_v46 = vpop.eup %2101 }
 0x661   : > { %v1108_v47 = vsel %vm893_vm6, %v2102_v46, 0.0 }
 0x662   : > { %1109 = vadd.xlane.f32.xlu0 %v1108_v47 }
 0x66f   : > { %1126 = vrot.lane.b32.xlu1 %v1123_v48, %s2233_s18 }
 0x676   : > { %v1101_v51 = vpop.xlane.xlu1 %1100 }
 0x677   : > { %2103 = vrcp.f32 %v1101_v51  ;;  %v2090_v51 = vld [vmem:[%s2431_s3 + $0x8] sm:$0xff]  }
 0x678   : > { %1219 = vrot.lane.b32.xlu0 %v1124_v49, %s2233_s18  ;;  %v2089_v49 = vld [vmem:[%s2431_s3] sm:$0xff]  }
 0x67a   : > { %v1104_v52 = vpop.xlane.xlu0 %1103 }
 0x67b   : > { %2105 = vrcp.f32 %v1104_v52  ;;  %v2091_v52 = vld [vmem:[%s2431_s3 + $0x10] sm:$0xff]  }
 0x681   : > { %v2104_v53 = vpop.eup %2103 }
 0x682   : > { %v1115_v57 = vmul.f32 %v2104_v53, %v2096_v32  ;;  %v2092_v53 = vld [vmem:[%s2431_s3 + $0x18] sm:$0xff]   ;;  %s2752_s3 = sld [smem:[#allocation20_spill]] (!%p1788_p1) }
 0x684   : > { %v1119_v61 = vpack.c.bf16 %v1115_v57, %v1115_v57 }
 0x685   : > { %v2106_v54 = vpop.eup %2105 }
 0x686   : > { %v1116_v58 = vmul.f32 %v2106_v54, %v2098_v35 }
 0x688   : > { %v1120_v55 = vpack.c.bf16 %v1116_v58, %v1116_v58 }
 0x6eb   : > { %v1107_v56 = vpop.xlane.xlu1 %1106 }
 0x6ec   : > { %2107 = vrcp.f32 %v1107_v56 }
 0x6ef   : > { %v1127_v59 = vpop.permute.xlu1 %1126  ;;  %v1110_v60 = vpop.xlane.xlu0 %1109 }
 0x6f0   : > { %v1133_v50 = vsel %vm1131_vm11, %v1127_v59, 0  ;;  %2109 = vrcp.f32 %v1110_v60 }
 0x6f1   : > { %1913 = vmatpush3.bf16.msra.mxu1 %v1133_v50  ;;  %1919 = vmatpush3.bf16.msra.mxu0 %v1133_v50 }
 0x6f2   : > { %1924 = vmatprep.subr.bf16.mxu1 %v2220_v38  ;;  %1930 = vmatprep.subr.bf16.mxu0 %v2220_v38 }
 0x6f3   : > { %v1220_v62 = vpop.permute.xlu0 %1219 }
 0x6f4   : > { %v1225_v63 = vsel %vm1131_vm11, %v1220_v62, 0  ;;  %1915 = vmatmul.mubr.msk.bf16.vlgmr.msra.gmra.mrb[8].mxu1 %vm893_vm6, %v1119_v61  ;;  %1921 = vmatmul.mubr.msk.bf16.vlgmr.msra.gmra.mrb[12].mxu0 %vm893_vm6, %v1120_v55 }
 0x6f5   : > { %1925 = vmatpush3.bf16.msra.mxu1 %v1225_v63  ;;  %1931 = vmatpush3.bf16.msra.mxu0 %v1225_v63 }
 0x6f6   : > { %v2108_v0 = vpop.eup %2107  ;;  %1926 = vmatprep.mubr.msk.bf16.mxu1 %vm2221_vm4, %v2220_v38  ;;  %1932 = vmatprep.mubr.msk.bf16.mxu0 %vm2221_vm4, %v2220_v38 }
 0x6f7   : > { %v1117_v1 = vmul.f32 %v2108_v0, %v2100_v44  ;;  %1936 = vmatprep.subr.bf16.mxu1 %v2220_v38  ;;  %1944 = vmatprep.subr.bf16.mxu0 %v2220_v38 }
 0x6f9   : > { %v1121_v2 = vpack.c.bf16 %v1117_v1, %v1117_v1 }
 0x6fa   : > { %v2110_v3 = vpop.eup %2109 }
 0x6fb   : > { %v1118_v4 = vmul.f32 %v2110_v3, %v2102_v46 }
 0x6fc   : > { %1927 = vmatmul.mubr.msk.bf16.vlgmr.msra.gmra.mrb[12].mxu1 %vm893_vm6, %v1121_v2 }
 0x6fd   : > { %v1122_v5 = vpack.c.bf16 %v1118_v4, %v1118_v4  ;;  %1940 = vmatprep.mubr.msk.bf16.mxu1 %vm2221_vm4, %v2220_v38  ;;  %1937 = vmatpush3.bf16.msra.mxu1 %v2085_v6 }
 0x6fe   : > { %1938 = vmatprep.subr.bf16.mxu1 %v2220_v38 }
 0x6ff   : > { %1933 = vmatmul.mubr.msk.bf16.vlgmr.msra.gmra.mrb[16].mxu0 %vm893_vm6, %v1122_v5 }
 0x700   : > { %1948 = vmatprep.mubr.msk.bf16.mxu0 %vm2221_vm4, %v2220_v38  ;;  %1945 = vmatpush3.bf16.msra.mxu0 %v2087_v40 }
 0x701   : > { %1939 = vmatpush3.bf16.msra.mxu1 %v2086_v7  ;;  %1946 = vmatprep.subr.bf16.mxu0 %v2220_v38 }
 0x702   : > { %1952 = vmatprep.subr.bf16.mxu1 %v2220_v38 }
 0x704   : > { %1947 = vmatpush3.bf16.msra.mxu0 %v2088_v41 }
 0x7c7   : > { %v1169_v8 = vpop.f32.mrb[8].mxu1  ;;  %v1212_v9 = vpop.f32.mrb[12].mxu0 }
 0x7c8   : > { %v1916_v10 = vpop.f32.mrb[9].mxu1  ;;  %1311 = vrot.lane.b32.xlu1 %v1212_v9, %s2234_s20  ;;  %v1922_v11 = vpop.f32.mrb[13].mxu0 }
 0x7c9   : > { %v1172_v12 = vpop.f32.mrb[10].mxu1  ;;  %v1215_v13 = vpop.f32.mrb[14].mxu0  ;;  %v1789_v11 = vld [vmem:[%s2752_s3] ss:$0 sm:$0xff] (!%p1788_p1) }
 0x7ca   : > { %v1917_v14 = vpop.f32.mrb[11].mxu1  ;;  %v1923_v15 = vpop.f32.mrb[15].mxu0 }
 0x7cf   : > { %v1261_v16 = vpop.f32.mrb[12].mxu1 }
 0x7d0   : > { %v1928_v17 = vpop.f32.mrb[13].mxu1  ;;  %1315 = vrot.lane.b32.xlu1 %v1261_v16, %s2235_s14 }
 0x7d1   : > { %v1264_v18 = vpop.f32.mrb[14].mxu1 }
 0x7d2   : > { %v1929_v19 = vpop.f32.mrb[15].mxu1  ;;  %v1304_v20 = vpop.f32.mrb[16].mxu0 }
 0x7d3   : > { %1319 = vrot.lane.b32.xlu0 %v1304_v20, %s2236_s30  ;;  %v1934_v21 = vpop.f32.mrb[17].mxu0 }
 0x7d4   : > { %v1307_v22 = vpop.f32.mrb[18].mxu0 }
 0x7d5   : > { %v1935_v23 = vpop.f32.mrb[19].mxu0 }
 0x83a   : > { %v1312_v24 = vpop.permute.xlu1 %1311 }
 0x83b   : > { %v1322_v26 = vsel %vm893_vm6, %v1169_v8, %v1312_v24 }
 0x842   : > { %v1316_v25 = vpop.permute.xlu1 %1315 }
 0x843   : > { %v1324_v27 = vsel %vm1323_vm12, %v1322_v26, %v1316_v25 }
 0x845   : > { %v1320_v28 = vpop.permute.xlu0 %1319 }
 0x846   : > { %v1326_v29 = vsel %vm1325_vm13, %v1324_v27, %v1320_v28 }
 0x847   : > { %v1327_v30 = vpack.c.bf16 %v1326_v29, %v1326_v29 }
 0x849   : > { %1941 = vmatmul.mubr.msk.bf16.vlgmr.msra.gmra.mrb[16].mxu1 %vm706_vm3, %v1327_v30 }
 0x84a   : > { %1960 = vmatprep.mubr.msk.bf16.mxu1 %vm2221_vm4, %v2220_v38  ;;  %1953 = vmatpush3.bf16.msra.mxu1 %v2089_v49 }
 0x84b   : > { %1954 = vmatprep.subr.bf16.mxu1 %v2220_v38 }
 0x84e   : > { %1955 = vmatpush3.bf16.msra.mxu1 %v2090_v51 }
 0x84f   : > { %1956 = vmatprep.subr.bf16.mxu1 %v2220_v38 }
 0x852   : > { %1957 = vmatpush3.bf16.msra.mxu1 %v2091_v52 }
 0x853   : > { %1958 = vmatprep.subr.bf16.mxu1 %v2220_v38 }
 0x856   : > { %1959 = vmatpush3.bf16.msra.mxu1 %v2092_v53 }
 0x91c   : > { %v1381_v31 = vpop.f32.mrb[16].mxu1 }
 0x91d   : > { %v1387_v32 = vadd.f32 %v1381_v31, %v2483_v34  ;;  %v1942_v33 = vpop.f32.mrb[17].mxu1 }
 0x91e   : > { %v1384_v35 = vpop.f32.mrb[18].mxu1 }
 0x91f   : > { %v1943_v36 = vpop.f32.mrb[19].mxu1  ;;  %v1389_v37 = vmul.f32 %v1387_v32, %v1387_v32 }
 0x921   : > { %v1390_v39 = vsel %vm706_vm3, %v1389_v37, 0.0 }
 0x922   : > { %1391 = vadd.xlane.f32.xlu1 %v1390_v39 }
 0x9af   : > { %v1392_v42 = vpop.xlane.xlu1 %1391 }
 0x9b0   : > { %v1393_v43 = vmul.f32 0.03125, %v1392_v42 }
 0x9b2   : > { %v1394_v34 = vadd.f32 1e-06, %v1393_v43 }
 0x9b4   : > { %2111 = vrsqrt.f32 %v1394_v34 }
 0x9be   : > { %v2112_v44 = vpop.eup %2111 }
 0x9bf   : > { %v1396_v46 = vmul.f32 %v2112_v44, %v1387_v32 }
 0x9c1   : > { %v1403_v47 = vmul.f32 %v1778_v45, %v1396_v46 }
 0x9c3   : > { %v1404_v48 = vpack.c.bf16 %v1403_v47, %v1403_v47 }
 0x9c5   : > { %1949 = vmatmul.mubr.msk.bf16.vlgmr.msra.gmra.mrb[20].mxu0 %vm706_vm3, %v1404_v48 }
 0xa98   : > { %v1458_v54 = vpop.f32.mrb[20].mxu0 }
 0xa99   : > { %1472 = vrot.lane.b32.xlu0 %v1458_v54, %s2237_s15  ;;  %v1950_v56 = vpop.f32.mrb[21].mxu0  ;;  %v1782_v59 = vmul.f32 -1.442695, %v1458_v54 }
 0xa9a   : > { %v1461_v57 = vpop.f32.mrb[22].mxu0 }
 0xa9b   : > { %v1951_v58 = vpop.f32.mrb[23].mxu0  ;;  %2113 = vpow2.f32 %v1782_v59 }
 0xaa5   : > { %v2114_v60 = vpop.eup %2113 }
 0xaa6   : > { %v1467_v50 = vadd.f32 1.0, %v2114_v60 }
 0xaa8   : > { %2115 = vrcp.f32 %v1467_v50 }
 0xab2   : > { %v2116_v61 = vpop.eup %2115 }
 0xab3   : > { %v1470_v55 = vmul.f32 %v2116_v61, %v1458_v54 }
 0xb0b   : > { %v1473_v62 = vpop.permute.xlu0 %1472 }
 0xb0c   : > { %v1475_v63 = vmul.f32 %v1473_v62, %v1470_v55 }
 0xb0e   : > { %v1476_v0 = vpack.c.bf16 %v1475_v63, %v1475_v63 }
 0xb10   : > { %1961 = vmatmul.mubr.msk.bf16.vlgmr.msra.gmra.mrb[20].mxu1 %vm1509_vm14, %v1476_v0 }
 0xbe0   : > { %1558 = sbr.rel (%p1788_p1) target bundleno = 3211 (0xc8b), region = 80 }
 0xbe3   : > { %v1547_v38 = vpop.f32.mrb[20].mxu1 }
 0xbe4   : > { %v1553_v1 = vadd.f32 %v1547_v38, %v1387_v32  ;;  %v1962_v2 = vpop.f32.mrb[21].mxu1 }
 0xbe5   : > { %v1550_v3 = vpop.f32.mrb[22].mxu1 }
 0xbe6   : > { %1554 = vst.msk [vmem:[#allocation2] sm:$0xff] %vm706_vm3, %v1553_v1  ;;  %v1963_v4 = vpop.f32.mrb[23].mxu1  ;;  %v1560_v5 = vmul.f32 (!%p1788_p1), %v1553_v1, %v1553_v1 }
 0xbe8   : > { %v1561_v6 = vsel %vm706_vm3, %v1560_v5, 0.0 }
 0xbe9   : > { %1562 = vadd.xlane.f32.xlu0 %v1561_v6 }
 0xc76   : > { %v1563_v7 = vpop.xlane.xlu0 %1562 }
 0xc77   : > { %v1564_v8 = vmul.f32 0.03125, %v1563_v7 }
 0xc79   : > { %v1565_v9 = vadd.f32 1e-06, %v1564_v8 }
 0xc7b   : > { %2117 = vrsqrt.f32 %v1565_v9 }
 0xc85   : > { %v2118_v10 = vpop.eup %2117 }
 0xc86   : > { %v1567_v12 = vmul.f32 %v2118_v10, %v1553_v1 }
 0xc88   : > { %v1574_v13 = vmul.f32 %v1789_v11, %v1567_v12 }
 0xc8a   : > { %1575 = vst.msk [vmem:[%s547_s5] sm:$0xff] %vm706_vm3, %v1574_v13 }
 0xc8b PF: > { %s2753_s28 = sld [smem:[#allocation9_spill]]  ;;  %s2756_s23 = sld [smem:[#allocation21_spill]] }
 0xc8c   : > { %s2754_s24 = sld [smem:[#allocation7_spill]]  ;;  %s1590_s26 = sshll.u32 %s547_s5, 4  ;;  %s1591_s26 = int_to_ptr.vmem [resolvable:$true] %s1590_s26 }
 0xc8d   : > { %s2119_s14 = scalar_lea.vmem %s1591_s26, 128  ;;  %s2238_s30 = smov [#allocation3]  }
 0xc8e   : > { %p2120_p2 = scmp.ne.s32.totalorder %s1591_s26, %s2119_s14  ;;  %s2123_s2 = sshll.u32 %s2238_s30, 4  ;;  %s2124_s2 = int_to_ptr.vmem [resolvable:$false] %s2123_s2 }
 0xc8f   : > { %s2125_s19 = scalar_lea.vmem %s2124_s2, 256  ;;  %p2126_p6 = scmp.lt.s32.totalorder %s1591_s26, %s2124_s2 }
 0xc90   : > { %p2121_p4 = pnand %p2120_p2, %p2358_p3  ;;  %p2127_p7 = scmp.lt.s32.totalorder %s2125_s19, %s2119_s14 }
 0xc91   : > { %s1791_s13 = sshll.u32 %s2753_s28, 7 }
 0xc92   : > { %s2650_s27 = scalar_lea.hbm %s2756_s23, %s1791_s13  ;;  %s2757_s18 = sand.u32 1, %s2754_s24  }
 0xc93   : > { %s1577_s20 = scalar_lea.sflag [#allocation4], %s2757_s18  ;;  %p2122_p5 = pneg %p2121_p4 }
 0xc94   : > { %p2128_p8 = por %p2127_p7, %p2126_p6 }
 0xc96   : > { %p2129_p10 = pnand %p2128_p8, %p2122_p5 }
 0xc98   : > { %2132 = shalt.err (!%p2129_p10)
}
 0xc99   : > { %s2133_s17 = scalar_lea.hbm %s2650_s27, 128  ;;  %s2137_s22 = scalar_lea.hbm %s2756_s23, 256 }
 0xc9a   : > { %p2134_p11 = scmp.ne.s32.totalorder %s2650_s27, %s2133_s17  ;;  %p2138_p0 = scmp.lt.u32.totalorder %s2650_s27, %s2756_s23 }
 0xc9b   : > { %p2139_p1 = scmp.lt.u32.totalorder %s2137_s22, %s2133_s17  ;;  %p2141_p4 = scmp.lt.u32.totalorder %s2133_s17, %s2650_s27 }
 0xc9c   : > { %p2135_p12 = pnand %p2134_p11, %p2358_p3 }
 0xc9d   : > { %p2140_p2 = por %p2139_p1, %p2138_p0 }
 0xc9e   : > { %p2136_p13 = pneg %p2135_p12 }
 0xc9f   : > { %p2142_p5 = por %p2141_p4, %p2140_p2 }
 0xca1   : > { %p2143_p6 = pnand %p2142_p5, %p2136_p13 }
 0xca3   : > { %2146 = shalt.err (!%p2143_p6)
}
 0xca4   : > { %1988 = dma.vmem_to_hbm [thread:$0]  (%p2358_p3), %s1591_s26, 128, %s2650_s27, %s1577_s20  }
 0xca5 PF: > { %s2758_s28 = sld [smem:[#allocation12_spill]]  ;;  %s2759_s24 = sld [smem:[#allocation6_spill]] }
 0xcab   : > { %p1994_p7 = scmp.ge.s32.totalorder %s2758_s28, 2  ;;  %s1602_s29 = sand.u32 1, %s2759_s24  }
 0xcac   : > { %s1603_s21 = scalar_lea.sflag [#allocation4], %s1602_s29 }
 0xcad   : > { %p1991_p8 = pnand %p1994_p7, %p2368_p9 }
 0xcaf   : > { %2180 = dma.done.wait (!%p1991_p8), %s1603_s21, 128  }
 0xcb0   : > { %2182 = vsyncadd (!%p1991_p8), %s1603_s21, 4294967168  ;;  %s26_s15 = sadd.s32 1, %s2758_s28   ;;  %s2761_s25 = sld [smem:[#allocation7_spill]] }
 0xcb1   : > { %p23_p10 = scmp.ge.s32.totalorder %s26_s15, 6   ;;  %s2762_s26 = sld [smem:[#allocation8_spill]] }
 0xcb2   : > { %s2763_s27 = sld [smem:[#allocation17_spill]]  ;;  %s2764_s28 = sld [smem:[#allocation10_spill]] }
 0xcb3   : > { %s2765_s29 = sld [smem:[#allocation11_spill]]  ;;  %s2766_s30 = sld [smem:[#allocation13_spill]] }
 0xcb4   : > { %s2767_s14 = sld [smem:[#allocation15_spill]]  ;;  %25 = sbr.rel (!%p23_p10) target bundleno = 10 (0xa), region = 139 }
 0xcbb   :  { %1608 = vsyncpa [#allocation4], 1 }
 0xcbc   :  { %1610 = vsyncpa [#allocation4 + $0x1], 1 }

</bundles_post_ra>
